<compile_context>
chip_gen: v7x
topology: tpu7x:2x2x1
jax: 0.10.0
libtpu: 0.0.40
codegen_flags: <defaults>
</compile_context>

<pallas_src>
import jax
import jax.numpy as jnp
from jax.experimental import pallas as pl
from jax.experimental.pallas import tpu as pltpu

HIDDEN = 512          # numberHiddenUnitsD
IN_FEATURES = 500     # logical fc1 input width
K_PAD = 512           # fc1 contraction dim padded to (8,128)-aligned size
OUT_CLASSES = 2       # logical number of logits
OUT_PAD = 128         # lane-dense padded logits width
BN_EPS = 1e-5
LEAKY_SLOPE = 0.01    # F.leaky_relu default


def _leaky_relu(x):
    return jnp.where(x > 0, x, LEAKY_SLOPE * x)


def _batchnorm_train(h, gamma, beta):
    """BatchNorm1d training mode (biased batch var), affine folded into one FMA."""
    mu = jnp.mean(h, axis=0, keepdims=True)
    var = jnp.mean((h - mu) * (h - mu), axis=0, keepdims=True)
    scale = gamma * jax.lax.rsqrt(var + BN_EPS)   # rsqrt -> EUP slot
    shift = beta - mu * scale
    return h * scale + shift                      # single mul + add on VPU


def discriminator_kernel(
    x_ref,                              # (B, K_PAD)   bf16, cols 500..511 are zero
    w1_ref, b1_ref, g1_ref, be1_ref,    # (K_PAD, H) bf16 ; (1, H) f32 each
    w2_ref, b2_ref, g2_ref, be2_ref,    # (H, H)     bf16 ; (1, H) f32 each
    w3_ref, b3_ref,                     # (H, OUT_PAD) bf16 ; (1, OUT_PAD) f32
    out_ref,                            # (B, OUT_PAD) f32 (only first 2 cols real)
):
    x = x_ref[...]                      # bf16 into the MXU, f32 accumulate

    # ---- fc1 -> bn1 -> leaky_relu ----
    h1 = jnp.dot(x, w1_ref[...], preferred_element_type=jnp.float32) + b1_ref[...]
    h1 = _leaky_relu(_batchnorm_train(h1, g1_ref[...], be1_ref[...]))

    # ---- fc2 -> bn2 -> leaky_relu ----
    h2 = jnp.dot(h1.astype(jnp.bfloat16), w2_ref[...],
                 preferred_element_type=jnp.float32) + b2_ref[...]
    h2 = _leaky_relu(_batchnorm_train(h2, g2_ref[...], be2_ref[...]))

    # ---- fc3 (lane-dense padded output) ----
    out = jnp.dot(h2.astype(jnp.bfloat16), w3_ref[...],
                  preferred_element_type=jnp.float32) + b3_ref[...]
    out_ref[...] = out


def prepare_params(params):
    """Convert f32 (in, out)-layout params into kernel layout:
       - fc weights cast to bf16; w1 zero-padded K 500->512; w3/b3 padded to 128 cols
       - biases and BN affine params stay f32 (elementwise math stays f32)."""
    w1, b1, g1, be1, w2, b2, g2, be2, w3, b3 = params
    w1p = jnp.zeros((K_PAD, HIDDEN), jnp.float32).at[:IN_FEATURES, :].set(w1)
    w3p = jnp.zeros((HIDDEN, OUT_PAD), jnp.float32).at[:, :OUT_CLASSES].set(w3)
    b3p = jnp.zeros((1, OUT_PAD), jnp.float32).at[:, :OUT_CLASSES].set(b3)
    return (
        w1p.astype(jnp.bfloat16), b1, g1, be1,
        w2.astype(jnp.bfloat16), b2, g2, be2,
        w3p.astype(jnp.bfloat16), b3p,
    )


@jax.jit
def discriminator_forward(x, kernel_params):
    """x: (B, 500) float32. kernel_params: output of prepare_params(init_params(key))."""
    B = x.shape[0]
    # Pad + quantize the input outside the kernel (zero cols x padded w1 zero rows = 0).
    xp = jnp.zeros((B, K_PAD), jnp.bfloat16).at[:, :IN_FEATURES].set(
        x.astype(jnp.bfloat16))

    n_in = 1 + len(kernel_params)
    flops = 2 * B * (K_PAD * HIDDEN + HIDDEN * HIDDEN + HIDDEN * OUT_PAD)
    weight_bytes = (K_PAD * HIDDEN + HIDDEN * HIDDEN + HIDDEN * OUT_PAD) * 2
    small_bytes = (6 * HIDDEN + OUT_PAD) * 4
    bytes_accessed = B * K_PAD * 2 + weight_bytes + small_bytes + B * OUT_PAD * 4

    out_padded = pl.pallas_call(
        discriminator_kernel,
        out_shape=jax.ShapeDtypeStruct((B, OUT_PAD), jnp.float32),
        # Tiny model: everything fits in VMEM -> single invocation, no grid
        # (also required so BatchNorm sees whole-batch statistics).
        in_specs=[pl.BlockSpec(memory_space=pltpu.MemorySpace.VMEM)] * n_in,
        out_specs=pl.BlockSpec(memory_space=pltpu.MemorySpace.VMEM),
        cost_estimate=pl.CostEstimate(
            flops=flops,
            transcendentals=2 * HIDDEN,          # rsqrt per feature x 2 BN layers
            bytes_accessed=bytes_accessed,
        ),
    )(xp, *kernel_params)
    return out_padded[:, :OUT_CLASSES]


def init_params(key):
    """Mimics nn.Linear default init U[-1/sqrt(fan_in), +1/sqrt(fan_in)];
    BatchNorm affine gamma=1, beta=0. Weights stored (in, out) = PyTorch W^T."""
    ks = jax.random.split(key, 6)

    def linear(kw, kb, fan_in, fan_out):
        bound = 1.0 / jnp.sqrt(fan_in)
        w = jax.random.uniform(kw, (fan_in, fan_out), jnp.float32, -bound, bound)
        b = jax.random.uniform(kb, (1, fan_out), jnp.float32, -bound, bound)
        return w, b

    w1, b1 = linear(ks[0], ks[1], IN_FEATURES, HIDDEN)
    w2, b2 = linear(ks[2], ks[3], HIDDEN, HIDDEN)
    w3, b3 = linear(ks[4], ks[5], HIDDEN, OUT_CLASSES)
    g1 = jnp.ones((1, HIDDEN), jnp.float32)
    be1 = jnp.zeros((1, HIDDEN), jnp.float32)
    g2 = jnp.ones((1, HIDDEN), jnp.float32)
    be2 = jnp.zeros((1, HIDDEN), jnp.float32)
    return (w1, b1, g1, be1, w2, b2, g2, be2, w3, b3)


def reference_forward(x, kernel_params):
    """Pure-JAX reference applying the same bf16 quantization as the kernel."""
    w1, b1, g1, be1, w2, b2, g2, be2, w3, b3 = kernel_params
    B = x.shape[0]
    xp = jnp.zeros((B, K_PAD), jnp.bfloat16).at[:, :IN_FEATURES].set(
        x.astype(jnp.bfloat16))
    h = jnp.dot(xp, w1, preferred_element_type=jnp.float32) + b1
    h = _leaky_relu(_batchnorm_train(h, g1, be1))
    h = jnp.dot(h.astype(jnp.bfloat16), w2, preferred_element_type=jnp.float32) + b2
    h = _leaky_relu(_batchnorm_train(h, g2, be2))
    out = jnp.dot(h.astype(jnp.bfloat16), w3, preferred_element_type=jnp.float32) + b3
    return out[:, :OUT_CLASSES]


if __name__ == "__main__":
    key = jax.random.PRNGKey(0)
    k_x, k_p = jax.random.split(key)

    B = 8  # small batch (BatchNorm1d needs B > 1 in training mode)
    x = jax.random.normal(k_x, (B, IN_FEATURES), jnp.float32)
    params = init_params(k_p)
    kparams = prepare_params(params)

    out = discriminator_forward(x, kparams)
    out = jax.block_until_ready(out)

    ref = reference_forward(x, kparams)
    assert out.shape == (B, OUT_CLASSES)
    assert jnp.allclose(out, ref, atol=2e-3, rtol=2e-3), "mismatch vs JAX reference"

    print("KERNEL_OK")
</pallas_src>

<mosaic_0001>
module attributes {stable_mosaic.version = 11 : i64} {
  func.func @discriminator_kernel(%arg0: memref<8x512xbf16, #tpu.memory_space<vmem>>, %arg1: memref<512x512xbf16, #tpu.memory_space<vmem>>, %arg2: memref<1x512xf32, #tpu.memory_space<vmem>>, %arg3: memref<1x512xf32, #tpu.memory_space<vmem>>, %arg4: memref<1x512xf32, #tpu.memory_space<vmem>>, %arg5: memref<512x512xbf16, #tpu.memory_space<vmem>>, %arg6: memref<1x512xf32, #tpu.memory_space<vmem>>, %arg7: memref<1x512xf32, #tpu.memory_space<vmem>>, %arg8: memref<1x512xf32, #tpu.memory_space<vmem>>, %arg9: memref<512x128xbf16, #tpu.memory_space<vmem>>, %arg10: memref<1x128xf32, #tpu.memory_space<vmem>>, %arg11: memref<8x128xf32, #tpu.memory_space<vmem>>) attributes {dimension_semantics = [], scalar_prefetch = 0 : i64, scratch_operands = 0 : i64, tpu.core_type = #tpu.core_type<tc>} {
    %c0 = arith.constant 0 : index
    %c0_0 = arith.constant 0 : index
    %0 = vector.load %arg0[%c0, %c0_0] : memref<8x512xbf16, #tpu.memory_space<vmem>>, vector<8x512xbf16>
    %c0_1 = arith.constant 0 : index
    %c0_2 = arith.constant 0 : index
    %1 = vector.load %arg1[%c0_1, %c0_2] : memref<512x512xbf16, #tpu.memory_space<vmem>>, vector<512x512xbf16>
    %cst = arith.constant dense<0.000000e+00> : vector<8x512xf32>
    %2 = tpu.matmul %0, %1, %cst {dimension_numbers = #tpu.dot_dimension_numbers<[1], [0], [0], [1], [0, 0, 1, 1], [], []>} : vector<8x512xbf16>, vector<512x512xbf16>, vector<8x512xf32> -> vector<8x512xf32>
    %c0_3 = arith.constant 0 : index
    %c0_4 = arith.constant 0 : index
    %3 = vector.load %arg2[%c0_3, %c0_4] : memref<1x512xf32, #tpu.memory_space<vmem>>, vector<1x512xf32>
    %4 = vector.broadcast %3 : vector<1x512xf32> to vector<8x512xf32>
    %5 = arith.addf %2, %4 : vector<8x512xf32>
    %c0_5 = arith.constant 0 : index
    %c0_6 = arith.constant 0 : index
    %6 = vector.load %arg3[%c0_5, %c0_6] : memref<1x512xf32, #tpu.memory_space<vmem>>, vector<1x512xf32>
    %c0_7 = arith.constant 0 : index
    %c0_8 = arith.constant 0 : index
    %7 = vector.load %arg4[%c0_7, %c0_8] : memref<1x512xf32, #tpu.memory_space<vmem>>, vector<1x512xf32>
    %cst_9 = arith.constant dense<0.000000e+00> : vector<512xf32>
    %8 = vector.multi_reduction <add>, %5, %cst_9 [0] : vector<8x512xf32> to vector<512xf32>
    %9 = vector.shape_cast %8 : vector<512xf32> to vector<1x512xf32>
    %cst_10 = arith.constant 8.000000e+00 : f32
    %10 = vector.broadcast %cst_10 : f32 to vector<1x512xf32>
    %11 = arith.divf %9, %10 : vector<1x512xf32>
    %12 = vector.broadcast %11 : vector<1x512xf32> to vector<8x512xf32>
    %13 = arith.subf %5, %12 : vector<8x512xf32>
    %14 = vector.broadcast %11 : vector<1x512xf32> to vector<8x512xf32>
    %15 = arith.subf %5, %14 : vector<8x512xf32>
    %16 = arith.mulf %13, %15 : vector<8x512xf32>
    %cst_11 = arith.constant dense<0.000000e+00> : vector<512xf32>
    %17 = vector.multi_reduction <add>, %16, %cst_11 [0] : vector<8x512xf32> to vector<512xf32>
    %18 = vector.shape_cast %17 : vector<512xf32> to vector<1x512xf32>
    %cst_12 = arith.constant 8.000000e+00 : f32
    %19 = vector.broadcast %cst_12 : f32 to vector<1x512xf32>
    %20 = arith.divf %18, %19 : vector<1x512xf32>
    %cst_13 = arith.constant 9.99999974E-6 : f32
    %21 = vector.broadcast %cst_13 : f32 to vector<1x512xf32>
    %22 = arith.addf %20, %21 : vector<1x512xf32>
    %23 = math.rsqrt %22 : vector<1x512xf32>
    %24 = arith.mulf %6, %23 : vector<1x512xf32>
    %25 = arith.mulf %11, %24 : vector<1x512xf32>
    %26 = arith.subf %7, %25 : vector<1x512xf32>
    %27 = vector.broadcast %24 : vector<1x512xf32> to vector<8x512xf32>
    %28 = arith.mulf %5, %27 : vector<8x512xf32>
    %29 = vector.broadcast %26 : vector<1x512xf32> to vector<8x512xf32>
    %30 = arith.addf %28, %29 : vector<8x512xf32>
    %cst_14 = arith.constant 0.000000e+00 : f32
    %31 = vector.broadcast %cst_14 : f32 to vector<8x512xf32>
    %32 = arith.cmpf ogt, %30, %31 : vector<8x512xf32>
    %cst_15 = arith.constant 0.00999999977 : f32
    %33 = vector.broadcast %cst_15 : f32 to vector<8x512xf32>
    %34 = arith.mulf %33, %30 : vector<8x512xf32>
    %35 = arith.select %32, %30, %34 : vector<8x512xi1>, vector<8x512xf32>
    %36 = arith.truncf %35 : vector<8x512xf32> to vector<8x512xbf16>
    %c0_16 = arith.constant 0 : index
    %c0_17 = arith.constant 0 : index
    %37 = vector.load %arg5[%c0_16, %c0_17] : memref<512x512xbf16, #tpu.memory_space<vmem>>, vector<512x512xbf16>
    %cst_18 = arith.constant dense<0.000000e+00> : vector<8x512xf32>
    %38 = tpu.matmul %36, %37, %cst_18 {dimension_numbers = #tpu.dot_dimension_numbers<[1], [0], [0], [1], [0, 0, 1, 1], [], []>} : vector<8x512xbf16>, vector<512x512xbf16>, vector<8x512xf32> -> vector<8x512xf32>
    %c0_19 = arith.constant 0 : index
    %c0_20 = arith.constant 0 : index
    %39 = vector.load %arg6[%c0_19, %c0_20] : memref<1x512xf32, #tpu.memory_space<vmem>>, vector<1x512xf32>
    %40 = vector.broadcast %39 : vector<1x512xf32> to vector<8x512xf32>
    %41 = arith.addf %38, %40 : vector<8x512xf32>
    %c0_21 = arith.constant 0 : index
    %c0_22 = arith.constant 0 : index
    %42 = vector.load %arg7[%c0_21, %c0_22] : memref<1x512xf32, #tpu.memory_space<vmem>>, vector<1x512xf32>
    %c0_23 = arith.constant 0 : index
    %c0_24 = arith.constant 0 : index
    %43 = vector.load %arg8[%c0_23, %c0_24] : memref<1x512xf32, #tpu.memory_space<vmem>>, vector<1x512xf32>
    %cst_25 = arith.constant dense<0.000000e+00> : vector<512xf32>
    %44 = vector.multi_reduction <add>, %41, %cst_25 [0] : vector<8x512xf32> to vector<512xf32>
    %45 = vector.shape_cast %44 : vector<512xf32> to vector<1x512xf32>
    %cst_26 = arith.constant 8.000000e+00 : f32
    %46 = vector.broadcast %cst_26 : f32 to vector<1x512xf32>
    %47 = arith.divf %45, %46 : vector<1x512xf32>
    %48 = vector.broadcast %47 : vector<1x512xf32> to vector<8x512xf32>
    %49 = arith.subf %41, %48 : vector<8x512xf32>
    %50 = vector.broadcast %47 : vector<1x512xf32> to vector<8x512xf32>
    %51 = arith.subf %41, %50 : vector<8x512xf32>
    %52 = arith.mulf %49, %51 : vector<8x512xf32>
    %cst_27 = arith.constant dense<0.000000e+00> : vector<512xf32>
    %53 = vector.multi_reduction <add>, %52, %cst_27 [0] : vector<8x512xf32> to vector<512xf32>
    %54 = vector.shape_cast %53 : vector<512xf32> to vector<1x512xf32>
    %cst_28 = arith.constant 8.000000e+00 : f32
    %55 = vector.broadcast %cst_28 : f32 to vector<1x512xf32>
    %56 = arith.divf %54, %55 : vector<1x512xf32>
    %cst_29 = arith.constant 9.99999974E-6 : f32
    %57 = vector.broadcast %cst_29 : f32 to vector<1x512xf32>
    %58 = arith.addf %56, %57 : vector<1x512xf32>
    %59 = math.rsqrt %58 : vector<1x512xf32>
    %60 = arith.mulf %42, %59 : vector<1x512xf32>
    %61 = arith.mulf %47, %60 : vector<1x512xf32>
    %62 = arith.subf %43, %61 : vector<1x512xf32>
    %63 = vector.broadcast %60 : vector<1x512xf32> to vector<8x512xf32>
    %64 = arith.mulf %41, %63 : vector<8x512xf32>
    %65 = vector.broadcast %62 : vector<1x512xf32> to vector<8x512xf32>
    %66 = arith.addf %64, %65 : vector<8x512xf32>
    %cst_30 = arith.constant 0.000000e+00 : f32
    %67 = vector.broadcast %cst_30 : f32 to vector<8x512xf32>
    %68 = arith.cmpf ogt, %66, %67 : vector<8x512xf32>
    %cst_31 = arith.constant 0.00999999977 : f32
    %69 = vector.broadcast %cst_31 : f32 to vector<8x512xf32>
    %70 = arith.mulf %69, %66 : vector<8x512xf32>
    %71 = arith.select %68, %66, %70 : vector<8x512xi1>, vector<8x512xf32>
    %72 = arith.truncf %71 : vector<8x512xf32> to vector<8x512xbf16>
    %c0_32 = arith.constant 0 : index
    %c0_33 = arith.constant 0 : index
    %73 = vector.load %arg9[%c0_32, %c0_33] : memref<512x128xbf16, #tpu.memory_space<vmem>>, vector<512x128xbf16>
    %cst_34 = arith.constant dense<0.000000e+00> : vector<8x128xf32>
    %74 = tpu.matmul %72, %73, %cst_34 {dimension_numbers = #tpu.dot_dimension_numbers<[1], [0], [0], [1], [0, 0, 1, 1], [], []>} : vector<8x512xbf16>, vector<512x128xbf16>, vector<8x128xf32> -> vector<8x128xf32>
    %c0_35 = arith.constant 0 : index
    %c0_36 = arith.constant 0 : index
    %75 = vector.load %arg10[%c0_35, %c0_36] : memref<1x128xf32, #tpu.memory_space<vmem>>, vector<1x128xf32>
    %76 = vector.broadcast %75 : vector<1x128xf32> to vector<8x128xf32>
    %77 = arith.addf %74, %76 : vector<8x128xf32>
    %c0_37 = arith.constant 0 : index
    %c0_38 = arith.constant 0 : index
    %78 = vector.load %arg11[%c0_37, %c0_38] : memref<8x128xf32, #tpu.memory_space<vmem>>, vector<8x128xf32>
    tpu.vector_store %arg11[%c0_37, %c0_38], %77 {strides = array<i32>} : memref<8x128xf32, #tpu.memory_space<vmem>>, vector<8x128xf32>,
    return
  }
}

</mosaic_0001>

<bundles_post_ra>
// kernel: discriminator_forward.1
= control target key start
LH: loop header
LB: loop body
LE: loop exit
PB: predicated region body
PF: predicated region fallthrough
CT: control target
= control target key end

     0   :  { %16 = vsyncpa [#allocation3], 0  ;;  %s3919_s0 = inlined_call_operand.vmem [shape: bf16[8,512], index: 0, kind: input, shape index: {}]   ;;  %s3920_s1 = inlined_call_operand.hbm [shape: bf16[512,512], index: 1, kind: input, shape index: {}]   ;;  %s3921_s2 = inlined_call_operand.vmem [shape: f32[1,512], index: 2, kind: input, shape index: {}]   ;;  %s3922_s3 = inlined_call_operand.vmem [shape: f32[1,512], index: 3, kind: input, shape index: {}]   ;;  %s3923_s4 = inlined_call_operand.vmem [shape: f32[1,512], index: 4, kind: input, shape index: {}]   ;;  %s3924_s5 = inlined_call_operand.hbm [shape: bf16[512,512], index: 5, kind: input, shape index: {}]   ;;  %s3925_s6 = inlined_call_operand.vmem [shape: f32[1,512], index: 6, kind: input, shape index: {}]   ;;  %s3926_s7 = inlined_call_operand.vmem [shape: f32[1,512], index: 7, kind: input, shape index: {}]   ;;  %s3927_s8 = inlined_call_operand.vmem [shape: f32[1,512], index: 8, kind: input, shape index: {}]   ;;  %s3928_s9 = inlined_call_operand.hbm [shape: bf16[512,128], index: 9, kind: input, shape index: {}]   ;;  %s3929_s10 = inlined_call_operand.vmem [shape: f32[1,128], index: 10, kind: input, shape index: {}]   ;;  %s3930_s11 = inlined_call_operand.vmem [shape: f32[8,128], index: 11, kind: output, shape index: {}]  }
   0x1   :  { %17 = vsyncpa [#allocation5], 0  ;;  %s3638_s17 = smov [#allocation4]   ;;  %s3639_s19 = smov [#allocation2]  }
   0x2   :  { %s43_s18 = sshll.u32 %s3638_s17, 4  ;;  %s25_s20 = sshll.u32 %s3639_s19, 4  ;;  %s44_s18 = int_to_ptr.vmem [resolvable:$true] %s43_s18  ;;  %s3706_s20 = int_to_ptr.vmem [resolvable:$true] %s25_s20 }
   0x3   :  { %s3568_s23 = scalar_lea.hbm %s3924_s5, 16384 }
   0x4   :  { %p3569_p0 = scmp.ne.s32.totalorder %s3924_s5, %s3568_s23  ;;  %p3572_p1 = scmp.lt.u32.totalorder %s3568_s23, %s3924_s5 }
   0x6   :  { %p3574_p2 = pnand %p3572_p1, %p3569_p0 }
   0x8   :  { %3577 = shalt.err (!%p3574_p2)
}
   0x9   :  { %s3578_s28 = scalar_lea.vmem %s44_s18, 16384  ;;  %p3583_p4 = scmp.lt.s32.totalorder %s44_s18, %s44_s18 }
   0xa   :  { %p3579_p3 = scmp.ne.s32.totalorder %s44_s18, %s3578_s28  ;;  %p3584_p5 = scmp.lt.s32.totalorder %s3578_s28, %s3578_s28 }
   0xc   :  { %p3585_p6 = por %p3584_p5, %p3583_p4 }
   0xe   :  { %p3586_p7 = pnand %p3585_p6, %p3579_p3 }
  0x10   :  { %3589 = shalt.err (!%p3586_p7)
}
  0x11   :  { %s3640_s29 = smov 256   ;;  %s3641_s30 = smov 16  }
  0x12   :  { %49 = dma.hbm_to_vmem [thread:$0]  %s3924_s5, 16384, %s44_s18, [#allocation5], %s3640_s29, %s3640_s29, %s3641_s30  }
  0x13   :  { %s3590_s16 = scalar_lea.hbm %s3920_s1, 16384 }
  0x14   :  { %p3591_p8 = scmp.ne.s32.totalorder %s3920_s1, %s3590_s16  ;;  %p3594_p9 = scmp.lt.u32.totalorder %s3590_s16, %s3920_s1 }
  0x16   :  { %p3596_p10 = pnand %p3594_p9, %p3591_p8 }
  0x18   :  { %3599 = shalt.err (!%p3596_p10)
}
  0x19   :  { %s3600_s23 = scalar_lea.vmem %s3706_s20, 16384  ;;  %p3605_p12 = scmp.lt.s32.totalorder %s3706_s20, %s3706_s20 }
  0x1a   :  { %p3601_p11 = scmp.ne.s32.totalorder %s3706_s20, %s3600_s23  ;;  %p3606_p13 = scmp.lt.s32.totalorder %s3600_s23, %s3600_s23 }
  0x1c   :  { %p3607_p0 = por %p3606_p13, %p3605_p12 }
  0x1e   :  { %p3608_p1 = pnand %p3607_p0, %p3601_p11 }
  0x20   :  { %3611 = shalt.err (!%p3608_p1)
}
  0x21   :  { %31 = dma.hbm_to_vmem [thread:$0]  %s3920_s1, 16384, %s3706_s20, [#allocation3], %s3640_s29, %s3640_s29, %s3641_s30  }
  0x22   :  { %s3642_s24 = smov [#allocation6]   ;;  %s3612_s28 = scalar_lea.hbm %s3928_s9, 4096 }
  0x23   :  { %s61_s25 = sshll.u32 %s3642_s24, 4  ;;  %p3613_p2 = scmp.ne.s32.totalorder %s3928_s9, %s3612_s28  ;;  %s62_s25 = int_to_ptr.vmem [resolvable:$true] %s61_s25 }
  0x24   :  { %p3616_p3 = scmp.lt.u32.totalorder %s3612_s28, %s3928_s9 }
  0x26   :  { %p3618_p4 = pnand %p3616_p3, %p3613_p2 }
  0x28   :  { %3621 = shalt.err (!%p3618_p4)
}
  0x29   :  { %s3622_s16 = scalar_lea.vmem %s62_s25, 4096  ;;  %p3627_p6 = scmp.lt.s32.totalorder %s62_s25, %s62_s25 }
  0x2a   :  { %p3623_p5 = scmp.ne.s32.totalorder %s62_s25, %s3622_s16  ;;  %p3628_p7 = scmp.lt.s32.totalorder %s3622_s16, %s3622_s16 }
  0x2c   :  { %p3629_p8 = por %p3628_p7, %p3627_p6 }
  0x2e   :  { %p3630_p9 = pnand %p3629_p8, %p3623_p5 }
  0x30   :  { %3633 = shalt.err (!%p3630_p9)
}
  0x31   :  { %s3643_s1 = smov 64   ;;  %s3644_s20 = smov 4  }
  0x32   :  { %67 = dma.hbm_to_vmem [thread:$0]  %s3928_s9, 4096, %s62_s25, [#allocation5], %s3643_s1, %s3643_s1, %s3644_s20  }
  0x33   :  { %3634 = dma.done.wait [#allocation3], 16384  }
  0x34   :  { %3635 = vsyncadd [#allocation3], 4294950912 }
  0x35   :  { %3636 = dma.done.wait [#allocation5], 20480  }
  0x36   :  { %3637 = vsyncadd [#allocation5], 4294946816  ;;  %v3132_v0 = vld [vmem:[#allocation2 + $0x4] ss:$16 sps:$4 sm:$0xff]   ;;  %v3134_v1 = vld [vmem:[#allocation2 + $0xc] ss:$16 sps:$4 sm:$0xff]  }
  0x37   :  { %886 = vmatprep.subr.bf16.mxu0 %v3132_v0  ;;  %v3136_v2 = vld [vmem:[#allocation2] ss:$16 sps:$4 sm:$0xff]   ;;  %v3137_v3 = vld [vmem:[#allocation2 + $0x8] ss:$16 sps:$4 sm:$0xff]   ;;  %968 = vmatprep.subr.bf16.mxu1 %v3134_v1  ;;  %v3138_v4 = vld [vmem:[#allocation2 + $0x24] ss:$16 sps:$4 sm:$0xff]  }
  0x38   :  { %887 = vmatpush1.bf16.msra.mxu0 %v3136_v2  ;;  %969 = vmatpush1.bf16.msra.mxu1 %v3137_v3  ;;  %v3140_v5 = vld [vmem:[#allocation2 + $0x2c] ss:$16 sps:$4 sm:$0xff]   ;;  %v3142_v6 = vld [vmem:[#allocation2 + $0x20] ss:$16 sps:$4 sm:$0xff]   ;;  %v3143_v7 = vld [vmem:[#allocation2 + $0x28] ss:$16 sps:$4 sm:$0xff]  }
  0x39   :  { %888 = vmatprep.subr.bf16.mxu0 %v3138_v4  ;;  %970 = vmatprep.subr.bf16.mxu1 %v3140_v5  ;;  %v3144_v8 = vld [vmem:[#allocation2 + $0x44] ss:$16 sps:$4 sm:$0xff]   ;;  %v3146_v9 = vld [vmem:[#allocation2 + $0x4c] ss:$16 sps:$4 sm:$0xff]   ;;  %v3148_v10 = vld [vmem:[#allocation2 + $0x40] ss:$16 sps:$4 sm:$0xff]  }
  0x3a   :  { %v3149_v11 = vld [vmem:[#allocation2 + $0x48] ss:$16 sps:$4 sm:$0xff]   ;;  %v3150_v12 = vld [vmem:[#allocation2 + $0x64] ss:$16 sps:$4 sm:$0xff]   ;;  %v3152_v13 = vld [vmem:[#allocation2 + $0x6c] ss:$16 sps:$4 sm:$0xff]  }
  0x3b   :  { %v3154_v14 = vld [vmem:[#allocation2 + $0x60] ss:$16 sps:$4 sm:$0xff]   ;;  %v3155_v15 = vld [vmem:[#allocation2 + $0x68] ss:$16 sps:$4 sm:$0xff]   ;;  %v3156_v16 = vld [vmem:[#allocation2 + $0x84] ss:$16 sps:$4 sm:$0xff]  }
  0x3c   :  { %889 = vmatpush1.bf16.msra.mxu0 %v3142_v6  ;;  %971 = vmatpush1.bf16.msra.mxu1 %v3143_v7  ;;  %v3158_v17 = vld [vmem:[#allocation2 + $0x8c] ss:$16 sps:$4 sm:$0xff]   ;;  %v3160_v18 = vld [vmem:[#allocation2 + $0x80] ss:$16 sps:$4 sm:$0xff]   ;;  %v3161_v19 = vld [vmem:[#allocation2 + $0x88] ss:$16 sps:$4 sm:$0xff]  }
  0x3d   :  { %890 = vmatprep.subr.bf16.mxu0 %v3144_v8  ;;  %972 = vmatprep.subr.bf16.mxu1 %v3146_v9  ;;  %v3162_v20 = vld [vmem:[#allocation2 + $0xa4] ss:$16 sps:$4 sm:$0xff]   ;;  %v3164_v21 = vld [vmem:[#allocation2 + $0xac] ss:$16 sps:$4 sm:$0xff]   ;;  %v3166_v22 = vld [vmem:[#allocation2 + $0xa0] ss:$16 sps:$4 sm:$0xff]  }
  0x3e   :  { %v3167_v23 = vld [vmem:[#allocation2 + $0xa8] ss:$16 sps:$4 sm:$0xff]   ;;  %v3168_v24 = vld [vmem:[#allocation2 + $0xc4] ss:$16 sps:$4 sm:$0xff]   ;;  %v3170_v25 = vld [vmem:[#allocation2 + $0xcc] ss:$16 sps:$4 sm:$0xff]  }
  0x3f   :  { %v3172_v26 = vld [vmem:[#allocation2 + $0xc0] ss:$16 sps:$4 sm:$0xff]   ;;  %v3173_v27 = vld [vmem:[#allocation2 + $0xc8] ss:$16 sps:$4 sm:$0xff]   ;;  %v3174_v28 = vld [vmem:[#allocation2 + $0xe4] ss:$16 sps:$4 sm:$0xff]  }
  0x40   :  { %891 = vmatpush1.bf16.msra.mxu0 %v3148_v10  ;;  %973 = vmatpush1.bf16.msra.mxu1 %v3149_v11  ;;  %v3176_v29 = vld [vmem:[#allocation2 + $0xec] ss:$16 sps:$4 sm:$0xff]   ;;  %v3178_v30 = vld [vmem:[#allocation2 + $0xe0] ss:$16 sps:$4 sm:$0xff]   ;;  %v3179_v31 = vld [vmem:[#allocation2 + $0xe8] ss:$16 sps:$4 sm:$0xff]  }
  0x41   :  { %892 = vmatprep.subr.bf16.mxu0 %v3150_v12  ;;  %974 = vmatprep.subr.bf16.mxu1 %v3152_v13  ;;  %v3180_v32 = vld [vmem:[#allocation2 + $0x104] ss:$16 sps:$4 sm:$0xff]   ;;  %v3182_v33 = vld [vmem:[#allocation2 + $0x10c] ss:$16 sps:$4 sm:$0xff]   ;;  %v3184_v34 = vld [vmem:[#allocation2 + $0x100] ss:$16 sps:$4 sm:$0xff]  }
  0x42   :  { %v3185_v35 = vld [vmem:[#allocation2 + $0x108] ss:$16 sps:$4 sm:$0xff]   ;;  %v3186_v36 = vld [vmem:[#allocation2 + $0x124] ss:$16 sps:$4 sm:$0xff]   ;;  %v3188_v37 = vld [vmem:[#allocation2 + $0x12c] ss:$16 sps:$4 sm:$0xff]  }
  0x43   :  { %v3190_v38 = vld [vmem:[#allocation2 + $0x120] ss:$16 sps:$4 sm:$0xff]   ;;  %v3191_v39 = vld [vmem:[#allocation2 + $0x128] ss:$16 sps:$4 sm:$0xff]   ;;  %v3192_v40 = vld [vmem:[#allocation2 + $0x144] ss:$16 sps:$4 sm:$0xff]  }
  0x44   :  { %893 = vmatpush1.bf16.msra.mxu0 %v3154_v14  ;;  %975 = vmatpush1.bf16.msra.mxu1 %v3155_v15  ;;  %v3194_v41 = vld [vmem:[#allocation2 + $0x14c] ss:$16 sps:$4 sm:$0xff]   ;;  %v3196_v42 = vld [vmem:[#allocation2 + $0x140] ss:$16 sps:$4 sm:$0xff]   ;;  %v3197_v43 = vld [vmem:[#allocation2 + $0x148] ss:$16 sps:$4 sm:$0xff]  }
  0x45   :  { %894 = vmatprep.subr.bf16.mxu0 %v3156_v16  ;;  %976 = vmatprep.subr.bf16.mxu1 %v3158_v17  ;;  %v3198_v44 = vld [vmem:[#allocation2 + $0x164] ss:$16 sps:$4 sm:$0xff]   ;;  %v3200_v45 = vld [vmem:[#allocation2 + $0x16c] ss:$16 sps:$4 sm:$0xff]   ;;  %v3202_v47 = vld [vmem:[#allocation2 + $0x160] ss:$16 sps:$4 sm:$0xff]  }
  0x46   :  { %v80_v46 = vld [vmem:[%s3919_s0] sm:$0xff]  ;;  %v3203_v49 = vld [vmem:[#allocation2 + $0x168] ss:$16 sps:$4 sm:$0xff]   ;;  %v3206_v51 = vld [vmem:[#allocation2 + $0x18c] ss:$16 sps:$4 sm:$0xff]  }
  0x47   :  { %v2764_v48 = vcombine.high %v80_v46, %v80_v46  ;;  %v3204_v50 = vld [vmem:[#allocation2 + $0x184] ss:$16 sps:$4 sm:$0xff]   ;;  %v3208_v52 = vld [vmem:[#allocation2 + $0x180] ss:$16 sps:$4 sm:$0xff]   ;;  %v3209_v53 = vld [vmem:[#allocation2 + $0x188] ss:$16 sps:$4 sm:$0xff]   ;;  %v2763_v4 = vcombine.low %v80_v46, %v80_v46 }
  0x48   :  { %895 = vmatpush1.bf16.msra.mxu0 %v3160_v18  ;;  %977 = vmatpush1.bf16.msra.mxu1 %v3161_v19  ;;  %v3210_v54 = vld [vmem:[#allocation2 + $0x1a4] ss:$16 sps:$4 sm:$0xff]   ;;  %v3212_v55 = vld [vmem:[#allocation2 + $0x1ac] ss:$16 sps:$4 sm:$0xff]   ;;  %v3214_v56 = vld [vmem:[#allocation2 + $0x1a0] ss:$16 sps:$4 sm:$0xff]  }
  0x49   :  { %896 = vmatprep.subr.bf16.mxu0 %v3162_v20  ;;  %978 = vmatprep.subr.bf16.mxu1 %v3164_v21  ;;  %v3215_v57 = vld [vmem:[#allocation2 + $0x1a8] ss:$16 sps:$4 sm:$0xff]   ;;  %v3216_v58 = vld [vmem:[#allocation2 + $0x1c4] ss:$16 sps:$4 sm:$0xff]   ;;  %v3218_v59 = vld [vmem:[#allocation2 + $0x1cc] ss:$16 sps:$4 sm:$0xff]  }
  0x4a   :  { %918 = vmatprep.mubr.bf16.mxu0 %v2764_v48  ;;  %1000 = vmatprep.mubr.bf16.mxu1 %v2764_v48  ;;  %v3220_v60 = vld [vmem:[#allocation2 + $0x1c0] ss:$16 sps:$4 sm:$0xff]   ;;  %v3221_v61 = vld [vmem:[#allocation2 + $0x1c8] ss:$16 sps:$4 sm:$0xff]   ;;  %v3222_v62 = vld [vmem:[#allocation2 + $0x1e4] ss:$16 sps:$4 sm:$0xff]  }
  0x4b   :  { %v3224_v63 = vld [vmem:[#allocation2 + $0x1ec] ss:$16 sps:$4 sm:$0xff]   ;;  %v3226_v0 = vld [vmem:[#allocation2 + $0x1e0] ss:$16 sps:$4 sm:$0xff]   ;;  %v3227_v1 = vld [vmem:[#allocation2 + $0x1e8] ss:$16 sps:$4 sm:$0xff]  }
  0x4c   :  { %897 = vmatpush1.bf16.msra.mxu0 %v3166_v22  ;;  %979 = vmatpush1.bf16.msra.mxu1 %v3167_v23  ;;  %v3232_v2 = vld [vmem:[#allocation2 + $0x204] ss:$16 sps:$4 sm:$0xff]   ;;  %v3235_v3 = vld [vmem:[#allocation2 + $0x20c] ss:$16 sps:$4 sm:$0xff]   ;;  %v3230_v5 = vld [vmem:[#allocation2 + $0x200] ss:$16 sps:$4 sm:$0xff]  }
  0x4d   :  { %898 = vmatprep.subr.bf16.mxu0 %v3168_v24  ;;  %980 = vmatprep.subr.bf16.mxu1 %v3170_v25  ;;  %v3233_v6 = vld [vmem:[#allocation2 + $0x208] ss:$16 sps:$4 sm:$0xff]   ;;  %v3238_v7 = vld [vmem:[#allocation2 + $0x224] ss:$16 sps:$4 sm:$0xff]   ;;  %v3241_v8 = vld [vmem:[#allocation2 + $0x22c] ss:$16 sps:$4 sm:$0xff]  }
  0x4e   :  { %v3236_v9 = vld [vmem:[#allocation2 + $0x220] ss:$16 sps:$4 sm:$0xff]   ;;  %v3239_v10 = vld [vmem:[#allocation2 + $0x228] ss:$16 sps:$4 sm:$0xff]   ;;  %v3244_v11 = vld [vmem:[#allocation2 + $0x244] ss:$16 sps:$4 sm:$0xff]  }
  0x4f   :  { %v3247_v12 = vld [vmem:[#allocation2 + $0x24c] ss:$16 sps:$4 sm:$0xff]   ;;  %v3242_v13 = vld [vmem:[#allocation2 + $0x240] ss:$16 sps:$4 sm:$0xff]   ;;  %v3245_v14 = vld [vmem:[#allocation2 + $0x248] ss:$16 sps:$4 sm:$0xff]  }
  0x50   :  { %899 = vmatpush1.bf16.msra.mxu0 %v3172_v26  ;;  %981 = vmatpush1.bf16.msra.mxu1 %v3173_v27  ;;  %v3250_v15 = vld [vmem:[#allocation2 + $0x264] ss:$16 sps:$4 sm:$0xff]   ;;  %v3253_v16 = vld [vmem:[#allocation2 + $0x26c] ss:$16 sps:$4 sm:$0xff]   ;;  %v3248_v17 = vld [vmem:[#allocation2 + $0x260] ss:$16 sps:$4 sm:$0xff]  }
  0x51   :  { %900 = vmatprep.subr.bf16.mxu0 %v3174_v28  ;;  %982 = vmatprep.subr.bf16.mxu1 %v3176_v29  ;;  %v3251_v18 = vld [vmem:[#allocation2 + $0x268] ss:$16 sps:$4 sm:$0xff]   ;;  %v3256_v19 = vld [vmem:[#allocation2 + $0x284] ss:$16 sps:$4 sm:$0xff]   ;;  %v3259_v20 = vld [vmem:[#allocation2 + $0x28c] ss:$16 sps:$4 sm:$0xff]  }
  0x52   :  { %v3254_v21 = vld [vmem:[#allocation2 + $0x280] ss:$16 sps:$4 sm:$0xff]   ;;  %v3257_v22 = vld [vmem:[#allocation2 + $0x288] ss:$16 sps:$4 sm:$0xff]   ;;  %v3262_v23 = vld [vmem:[#allocation2 + $0x2a4] ss:$16 sps:$4 sm:$0xff]  }
  0x53   :  { %v3265_v24 = vld [vmem:[#allocation2 + $0x2ac] ss:$16 sps:$4 sm:$0xff]   ;;  %v3260_v25 = vld [vmem:[#allocation2 + $0x2a0] ss:$16 sps:$4 sm:$0xff]   ;;  %v3263_v26 = vld [vmem:[#allocation2 + $0x2a8] ss:$16 sps:$4 sm:$0xff]  }
  0x54   :  { %901 = vmatpush1.bf16.msra.mxu0 %v3178_v30  ;;  %983 = vmatpush1.bf16.msra.mxu1 %v3179_v31  ;;  %v3268_v27 = vld [vmem:[#allocation2 + $0x2c4] ss:$16 sps:$4 sm:$0xff]   ;;  %v3271_v28 = vld [vmem:[#allocation2 + $0x2cc] ss:$16 sps:$4 sm:$0xff]   ;;  %v3266_v30 = vld [vmem:[#allocation2 + $0x2c0] ss:$16 sps:$4 sm:$0xff]  }
  0x55   :  { %902 = vmatprep.subr.bf16.mxu0 %v3180_v32  ;;  %984 = vmatprep.subr.bf16.mxu1 %v3182_v33  ;;  %v3755_v29 = vld [vmem:[%s3919_s0 + $0x8] sm:$0xff]  ;;  %v3274_v33 = vld [vmem:[#allocation2 + $0x2e4] ss:$16 sps:$4 sm:$0xff]  }
  0x56   :  { %v3269_v31 = vld [vmem:[#allocation2 + $0x2c8] ss:$16 sps:$4 sm:$0xff]   ;;  %v2766_v32 = vcombine.high %v3755_v29, %v3755_v29  ;;  %v3295_v46 = vld [vmem:[#allocation2 + $0x34c] ss:$16 sps:$4 sm:$0xff]  }
  0x57   :  { %v3293_v48 = vld [vmem:[#allocation2 + $0x348] ss:$16 sps:$4 sm:$0xff]  }
  0x58   :  { %903 = vmatpush1.bf16.msra.mxu0 %v3184_v34  ;;  %985 = vmatpush1.bf16.msra.mxu1 %v3185_v35  ;;  %v3277_v34 = vld [vmem:[#allocation2 + $0x2ec] ss:$16 sps:$4 sm:$0xff]   ;;  %v3272_v35 = vld [vmem:[#allocation2 + $0x2e0] ss:$16 sps:$4 sm:$0xff]  }
  0x59   :  { %904 = vmatprep.subr.bf16.mxu0 %v3186_v36  ;;  %986 = vmatprep.subr.bf16.mxu1 %v3188_v37  ;;  %v3275_v36 = vld [vmem:[#allocation2 + $0x2e8] ss:$16 sps:$4 sm:$0xff]   ;;  %v3280_v37 = vld [vmem:[#allocation2 + $0x304] ss:$16 sps:$4 sm:$0xff]  }
  0x5c   :  { %905 = vmatpush1.bf16.msra.mxu0 %v3190_v38  ;;  %987 = vmatpush1.bf16.msra.mxu1 %v3191_v39  ;;  %v3283_v38 = vld [vmem:[#allocation2 + $0x30c] ss:$16 sps:$4 sm:$0xff]   ;;  %v3278_v39 = vld [vmem:[#allocation2 + $0x300] ss:$16 sps:$4 sm:$0xff]  }
  0x5d   :  { %906 = vmatprep.subr.bf16.mxu0 %v3192_v40  ;;  %988 = vmatprep.subr.bf16.mxu1 %v3194_v41  ;;  %v3281_v40 = vld [vmem:[#allocation2 + $0x308] ss:$16 sps:$4 sm:$0xff]   ;;  %v3286_v41 = vld [vmem:[#allocation2 + $0x324] ss:$16 sps:$4 sm:$0xff]  }
  0x60   :  { %907 = vmatpush1.bf16.msra.mxu0 %v3196_v42  ;;  %989 = vmatpush1.bf16.msra.mxu1 %v3197_v43  ;;  %v3289_v42 = vld [vmem:[#allocation2 + $0x32c] ss:$16 sps:$4 sm:$0xff]   ;;  %v3284_v43 = vld [vmem:[#allocation2 + $0x320] ss:$16 sps:$4 sm:$0xff]  }
  0x61   :  { %908 = vmatprep.subr.bf16.mxu0 %v3198_v44  ;;  %990 = vmatprep.subr.bf16.mxu1 %v3200_v45  ;;  %v3287_v44 = vld [vmem:[#allocation2 + $0x328] ss:$16 sps:$4 sm:$0xff]   ;;  %v3292_v45 = vld [vmem:[#allocation2 + $0x344] ss:$16 sps:$4 sm:$0xff]  }
  0x64   :  { %909 = vmatpush1.bf16.msra.mxu0 %v3202_v47  ;;  %991 = vmatpush1.bf16.msra.mxu1 %v3203_v49  ;;  %v3290_v47 = vld [vmem:[#allocation2 + $0x340] ss:$16 sps:$4 sm:$0xff]   ;;  %v3298_v49 = vld [vmem:[#allocation2 + $0x364] ss:$16 sps:$4 sm:$0xff]  }
  0x65   :  { %910 = vmatprep.subr.bf16.mxu0 %v3204_v50  ;;  %992 = vmatprep.subr.bf16.mxu1 %v3206_v51  ;;  %v3301_v50 = vld [vmem:[#allocation2 + $0x36c] ss:$16 sps:$4 sm:$0xff]   ;;  %v3296_v51 = vld [vmem:[#allocation2 + $0x360] ss:$16 sps:$4 sm:$0xff]  }
  0x68   :  { %911 = vmatpush1.bf16.msra.mxu0 %v3208_v52  ;;  %993 = vmatpush1.bf16.msra.mxu1 %v3209_v53  ;;  %v3299_v52 = vld [vmem:[#allocation2 + $0x368] ss:$16 sps:$4 sm:$0xff]   ;;  %v3304_v53 = vld [vmem:[#allocation2 + $0x384] ss:$16 sps:$4 sm:$0xff]  }
  0x69   :  { %912 = vmatprep.subr.bf16.mxu0 %v3210_v54  ;;  %994 = vmatprep.subr.bf16.mxu1 %v3212_v55  ;;  %v3307_v54 = vld [vmem:[#allocation2 + $0x38c] ss:$16 sps:$4 sm:$0xff]   ;;  %v3302_v55 = vld [vmem:[#allocation2 + $0x380] ss:$16 sps:$4 sm:$0xff]  }
  0x6c   :  { %913 = vmatpush1.bf16.msra.mxu0 %v3214_v56  ;;  %995 = vmatpush1.bf16.msra.mxu1 %v3215_v57  ;;  %v3305_v56 = vld [vmem:[#allocation2 + $0x388] ss:$16 sps:$4 sm:$0xff]   ;;  %v3310_v57 = vld [vmem:[#allocation2 + $0x3a4] ss:$16 sps:$4 sm:$0xff]  }
  0x6d   :  { %914 = vmatprep.subr.bf16.mxu0 %v3216_v58  ;;  %996 = vmatprep.subr.bf16.mxu1 %v3218_v59  ;;  %v3313_v58 = vld [vmem:[#allocation2 + $0x3ac] ss:$16 sps:$4 sm:$0xff]   ;;  %v3308_v59 = vld [vmem:[#allocation2 + $0x3a0] ss:$16 sps:$4 sm:$0xff]  }
  0x70   :  { %915 = vmatpush1.bf16.msra.mxu0 %v3220_v60  ;;  %997 = vmatpush1.bf16.msra.mxu1 %v3221_v61  ;;  %v3311_v60 = vld [vmem:[#allocation2 + $0x3a8] ss:$16 sps:$4 sm:$0xff]   ;;  %v3316_v61 = vld [vmem:[#allocation2 + $0x3c4] ss:$16 sps:$4 sm:$0xff]  }
  0x71   :  { %916 = vmatprep.subr.bf16.mxu0 %v3222_v62  ;;  %998 = vmatprep.subr.bf16.mxu1 %v3224_v63  ;;  %v3319_v62 = vld [vmem:[#allocation2 + $0x3cc] ss:$16 sps:$4 sm:$0xff]   ;;  %v3314_v63 = vld [vmem:[#allocation2 + $0x3c0] ss:$16 sps:$4 sm:$0xff]  }
  0x74   :  { %917 = vmatpush1.bf16.msra.mxu0 %v3226_v0  ;;  %999 = vmatpush1.bf16.msra.mxu1 %v3227_v1  ;;  %v3317_v0 = vld [vmem:[#allocation2 + $0x3c8] ss:$16 sps:$4 sm:$0xff]   ;;  %v3322_v1 = vld [vmem:[#allocation2 + $0x3e4] ss:$16 sps:$4 sm:$0xff]  }
  0x75   :  { %927 = vmatprep.subr.bf16.mxu0 %v3232_v2  ;;  %1009 = vmatprep.subr.bf16.mxu1 %v3235_v3  ;;  %v3325_v2 = vld [vmem:[#allocation2 + $0x3ec] ss:$16 sps:$4 sm:$0xff]   ;;  %v3320_v3 = vld [vmem:[#allocation2 + $0x3e0] ss:$16 sps:$4 sm:$0xff]  }
  0x77   :  { %919 = vmatmul.mubr.bf16.vlgmr.msra.gmra.mrb[0].mxu0 %v2763_v4  ;;  %1001 = vmatmul.mubr.bf16.vlgmr.msra.gmra.mrb[0].mxu1 %v2763_v4  ;;  %v3323_v4 = vld [vmem:[#allocation2 + $0x3e8] ss:$16 sps:$4 sm:$0xff]  }
  0x78   :  { %928 = vmatpush1.bf16.msra.mxu0 %v3230_v5  ;;  %1010 = vmatpush1.bf16.msra.mxu1 %v3233_v6  ;;  %v2765_v5 = vcombine.low %v3755_v29, %v3755_v29  ;;  %v3330_v6 = vld [vmem:[#allocation4 + $0x4] ss:$16 sps:$4 sm:$0xff]   ;;  %v3361_v29 = vld [vmem:[#allocation4 + $0xa8] ss:$16 sps:$4 sm:$0xff]  }
  0x79   :  { %929 = vmatprep.subr.bf16.mxu0 %v3238_v7  ;;  %1011 = vmatprep.subr.bf16.mxu1 %v3241_v8  ;;  %v3333_v7 = vld [vmem:[#allocation4 + $0xc] ss:$16 sps:$4 sm:$0xff]   ;;  %v3328_v8 = vld [vmem:[#allocation4] ss:$16 sps:$4 sm:$0xff]  }
  0x7a   :  { %959 = vmatprep.mubr.bf16.mxu0 %v2766_v32  ;;  %1041 = vmatprep.mubr.bf16.mxu1 %v2766_v32  ;;  %v3364_v32 = vld [vmem:[#allocation4 + $0xc0] ss:$16 sps:$4 sm:$0xff]  }
  0x7c   :  { %930 = vmatpush1.bf16.msra.mxu0 %v3236_v9  ;;  %1012 = vmatpush1.bf16.msra.mxu1 %v3239_v10  ;;  %v3331_v9 = vld [vmem:[#allocation4 + $0x8] ss:$16 sps:$4 sm:$0xff]   ;;  %v3336_v10 = vld [vmem:[#allocation4 + $0x24] ss:$16 sps:$4 sm:$0xff]  }
  0x7d   :  { %931 = vmatprep.subr.bf16.mxu0 %v3244_v11  ;;  %1013 = vmatprep.subr.bf16.mxu1 %v3247_v12  ;;  %v3339_v11 = vld [vmem:[#allocation4 + $0x2c] ss:$16 sps:$4 sm:$0xff]   ;;  %v3334_v12 = vld [vmem:[#allocation4 + $0x20] ss:$16 sps:$4 sm:$0xff]  }
  0x80   :  { %932 = vmatpush1.bf16.msra.mxu0 %v3242_v13  ;;  %1014 = vmatpush1.bf16.msra.mxu1 %v3245_v14  ;;  %v3337_v13 = vld [vmem:[#allocation4 + $0x28] ss:$16 sps:$4 sm:$0xff]   ;;  %v3342_v14 = vld [vmem:[#allocation4 + $0x44] ss:$16 sps:$4 sm:$0xff]  }
  0x81   :  { %933 = vmatprep.subr.bf16.mxu0 %v3250_v15  ;;  %1015 = vmatprep.subr.bf16.mxu1 %v3253_v16  ;;  %v3345_v15 = vld [vmem:[#allocation4 + $0x4c] ss:$16 sps:$4 sm:$0xff]   ;;  %v3340_v16 = vld [vmem:[#allocation4 + $0x40] ss:$16 sps:$4 sm:$0xff]  }
  0x84   :  { %934 = vmatpush1.bf16.msra.mxu0 %v3248_v17  ;;  %1016 = vmatpush1.bf16.msra.mxu1 %v3251_v18  ;;  %v3343_v17 = vld [vmem:[#allocation4 + $0x48] ss:$16 sps:$4 sm:$0xff]   ;;  %v3348_v18 = vld [vmem:[#allocation4 + $0x64] ss:$16 sps:$4 sm:$0xff]  }
  0x85   :  { %935 = vmatprep.subr.bf16.mxu0 %v3256_v19  ;;  %1017 = vmatprep.subr.bf16.mxu1 %v3259_v20  ;;  %v3351_v19 = vld [vmem:[#allocation4 + $0x6c] ss:$16 sps:$4 sm:$0xff]   ;;  %v3346_v20 = vld [vmem:[#allocation4 + $0x60] ss:$16 sps:$4 sm:$0xff]  }
  0x88   :  { %936 = vmatpush1.bf16.msra.mxu0 %v3254_v21  ;;  %1018 = vmatpush1.bf16.msra.mxu1 %v3257_v22  ;;  %v3349_v21 = vld [vmem:[#allocation4 + $0x68] ss:$16 sps:$4 sm:$0xff]   ;;  %v3354_v22 = vld [vmem:[#allocation4 + $0x84] ss:$16 sps:$4 sm:$0xff]  }
  0x89   :  { %937 = vmatprep.subr.bf16.mxu0 %v3262_v23  ;;  %1019 = vmatprep.subr.bf16.mxu1 %v3265_v24  ;;  %v3357_v23 = vld [vmem:[#allocation4 + $0x8c] ss:$16 sps:$4 sm:$0xff]   ;;  %v3352_v24 = vld [vmem:[#allocation4 + $0x80] ss:$16 sps:$4 sm:$0xff]  }
  0x8c   :  { %938 = vmatpush1.bf16.msra.mxu0 %v3260_v25  ;;  %1020 = vmatpush1.bf16.msra.mxu1 %v3263_v26  ;;  %v3355_v25 = vld [vmem:[#allocation4 + $0x88] ss:$16 sps:$4 sm:$0xff]   ;;  %v3360_v26 = vld [vmem:[#allocation4 + $0xa4] ss:$16 sps:$4 sm:$0xff]  }
  0x8d   :  { %939 = vmatprep.subr.bf16.mxu0 %v3268_v27  ;;  %1021 = vmatprep.subr.bf16.mxu1 %v3271_v28  ;;  %v3363_v27 = vld [vmem:[#allocation4 + $0xac] ss:$16 sps:$4 sm:$0xff]   ;;  %v3358_v28 = vld [vmem:[#allocation4 + $0xa0] ss:$16 sps:$4 sm:$0xff]  }
  0x90   :  { %940 = vmatpush1.bf16.msra.mxu0 %v3266_v30  ;;  %1022 = vmatpush1.bf16.msra.mxu1 %v3269_v31  ;;  %v3366_v30 = vld [vmem:[#allocation4 + $0xc4] ss:$16 sps:$4 sm:$0xff]   ;;  %v3369_v31 = vld [vmem:[#allocation4 + $0xcc] ss:$16 sps:$4 sm:$0xff]  }
  0x91   :  { %941 = vmatprep.subr.bf16.mxu0 %v3274_v33  ;;  %1023 = vmatprep.subr.bf16.mxu1 %v3277_v34  ;;  %v3367_v33 = vld [vmem:[#allocation4 + $0xc8] ss:$16 sps:$4 sm:$0xff]   ;;  %v3372_v34 = vld [vmem:[#allocation4 + $0xe4] ss:$16 sps:$4 sm:$0xff]  }
  0x94   :  { %942 = vmatpush1.bf16.msra.mxu0 %v3272_v35  ;;  %1024 = vmatpush1.bf16.msra.mxu1 %v3275_v36  ;;  %v3375_v35 = vld [vmem:[#allocation4 + $0xec] ss:$16 sps:$4 sm:$0xff]   ;;  %v3370_v36 = vld [vmem:[#allocation4 + $0xe0] ss:$16 sps:$4 sm:$0xff]  }
  0x95   :  { %943 = vmatprep.subr.bf16.mxu0 %v3280_v37  ;;  %1025 = vmatprep.subr.bf16.mxu1 %v3283_v38  ;;  %v3373_v37 = vld [vmem:[#allocation4 + $0xe8] ss:$16 sps:$4 sm:$0xff]   ;;  %v3378_v38 = vld [vmem:[#allocation4 + $0x104] ss:$16 sps:$4 sm:$0xff]  }
  0x98   :  { %944 = vmatpush1.bf16.msra.mxu0 %v3278_v39  ;;  %1026 = vmatpush1.bf16.msra.mxu1 %v3281_v40  ;;  %v3381_v39 = vld [vmem:[#allocation4 + $0x10c] ss:$16 sps:$4 sm:$0xff]   ;;  %v3376_v40 = vld [vmem:[#allocation4 + $0x100] ss:$16 sps:$4 sm:$0xff]  }
  0x99   :  { %945 = vmatprep.subr.bf16.mxu0 %v3286_v41  ;;  %1027 = vmatprep.subr.bf16.mxu1 %v3289_v42  ;;  %v3379_v41 = vld [vmem:[#allocation4 + $0x108] ss:$16 sps:$4 sm:$0xff]   ;;  %v3384_v42 = vld [vmem:[#allocation4 + $0x124] ss:$16 sps:$4 sm:$0xff]  }
  0x9c   :  { %946 = vmatpush1.bf16.msra.mxu0 %v3284_v43  ;;  %1028 = vmatpush1.bf16.msra.mxu1 %v3287_v44  ;;  %v3387_v43 = vld [vmem:[#allocation4 + $0x12c] ss:$16 sps:$4 sm:$0xff]   ;;  %v3382_v44 = vld [vmem:[#allocation4 + $0x120] ss:$16 sps:$4 sm:$0xff]  }
  0x9d   :  { %947 = vmatprep.subr.bf16.mxu0 %v3292_v45  ;;  %1029 = vmatprep.subr.bf16.mxu1 %v3295_v46  ;;  %v3385_v45 = vld [vmem:[#allocation4 + $0x128] ss:$16 sps:$4 sm:$0xff]   ;;  %v3390_v46 = vld [vmem:[#allocation4 + $0x144] ss:$16 sps:$4 sm:$0xff]  }
  0xa0   :  { %948 = vmatpush1.bf16.msra.mxu0 %v3290_v47  ;;  %1030 = vmatpush1.bf16.msra.mxu1 %v3293_v48  ;;  %v3393_v47 = vld [vmem:[#allocation4 + $0x14c] ss:$16 sps:$4 sm:$0xff]   ;;  %v3388_v48 = vld [vmem:[#allocation4 + $0x140] ss:$16 sps:$4 sm:$0xff]  }
  0xa1   :  { %949 = vmatprep.subr.bf16.mxu0 %v3298_v49  ;;  %1031 = vmatprep.subr.bf16.mxu1 %v3301_v50  ;;  %v3391_v49 = vld [vmem:[#allocation4 + $0x148] ss:$16 sps:$4 sm:$0xff]   ;;  %v3396_v50 = vld [vmem:[#allocation4 + $0x164] ss:$16 sps:$4 sm:$0xff]  }
  0xa4   :  { %950 = vmatpush1.bf16.msra.mxu0 %v3296_v51  ;;  %1032 = vmatpush1.bf16.msra.mxu1 %v3299_v52  ;;  %v3399_v51 = vld [vmem:[#allocation4 + $0x16c] ss:$16 sps:$4 sm:$0xff]   ;;  %v3394_v52 = vld [vmem:[#allocation4 + $0x160] ss:$16 sps:$4 sm:$0xff]  }
  0xa5   :  { %951 = vmatprep.subr.bf16.mxu0 %v3304_v53  ;;  %1033 = vmatprep.subr.bf16.mxu1 %v3307_v54  ;;  %v3397_v53 = vld [vmem:[#allocation4 + $0x168] ss:$16 sps:$4 sm:$0xff]   ;;  %v3402_v54 = vld [vmem:[#allocation4 + $0x184] ss:$16 sps:$4 sm:$0xff]  }
  0xa8   :  { %952 = vmatpush1.bf16.msra.mxu0 %v3302_v55  ;;  %1034 = vmatpush1.bf16.msra.mxu1 %v3305_v56  ;;  %v3405_v55 = vld [vmem:[#allocation4 + $0x18c] ss:$16 sps:$4 sm:$0xff]   ;;  %v3400_v56 = vld [vmem:[#allocation4 + $0x180] ss:$16 sps:$4 sm:$0xff]  }
  0xa9   :  { %953 = vmatprep.subr.bf16.mxu0 %v3310_v57  ;;  %1035 = vmatprep.subr.bf16.mxu1 %v3313_v58  ;;  %v3403_v57 = vld [vmem:[#allocation4 + $0x188] ss:$16 sps:$4 sm:$0xff]   ;;  %v3408_v58 = vld [vmem:[#allocation4 + $0x1a4] ss:$16 sps:$4 sm:$0xff]  }
  0xac   :  { %954 = vmatpush1.bf16.msra.mxu0 %v3308_v59  ;;  %1036 = vmatpush1.bf16.msra.mxu1 %v3311_v60  ;;  %v3411_v59 = vld [vmem:[#allocation4 + $0x1ac] ss:$16 sps:$4 sm:$0xff]   ;;  %v3406_v60 = vld [vmem:[#allocation4 + $0x1a0] ss:$16 sps:$4 sm:$0xff]  }
  0xad   :  { %955 = vmatprep.subr.bf16.mxu0 %v3316_v61  ;;  %1037 = vmatprep.subr.bf16.mxu1 %v3319_v62  ;;  %v3409_v61 = vld [vmem:[#allocation4 + $0x1a8] ss:$16 sps:$4 sm:$0xff]   ;;  %v3414_v62 = vld [vmem:[#allocation4 + $0x1c4] ss:$16 sps:$4 sm:$0xff]  }
  0xb0   :  { %956 = vmatpush1.bf16.msra.mxu0 %v3314_v63  ;;  %1038 = vmatpush1.bf16.msra.mxu1 %v3317_v0  ;;  %v3417_v63 = vld [vmem:[#allocation4 + $0x1cc] ss:$16 sps:$4 sm:$0xff]   ;;  %v3412_v0 = vld [vmem:[#allocation4 + $0x1c0] ss:$16 sps:$4 sm:$0xff]  }
  0xb1   :  { %957 = vmatprep.subr.bf16.mxu0 %v3322_v1  ;;  %1039 = vmatprep.subr.bf16.mxu1 %v3325_v2  ;;  %v3415_v1 = vld [vmem:[#allocation4 + $0x1c8] ss:$16 sps:$4 sm:$0xff]   ;;  %v3420_v2 = vld [vmem:[#allocation4 + $0x1e4] ss:$16 sps:$4 sm:$0xff]  }
  0xb4   :  { %958 = vmatpush1.bf16.msra.mxu0 %v3320_v3  ;;  %1040 = vmatpush1.bf16.msra.mxu1 %v3323_v4  ;;  %v3423_v3 = vld [vmem:[#allocation4 + $0x1ec] ss:$16 sps:$4 sm:$0xff]   ;;  %v3418_v4 = vld [vmem:[#allocation4 + $0x1e0] ss:$16 sps:$4 sm:$0xff]  }
  0xb5   :  { %2045 = vmatprep.subr.bf16.mxu0 %v3330_v6  ;;  %2127 = vmatprep.subr.bf16.mxu1 %v3333_v7  ;;  %v3426_v6 = vld [vmem:[#allocation4 + $0x204] ss:$16 sps:$4 sm:$0xff]   ;;  %v3429_v7 = vld [vmem:[#allocation4 + $0x20c] ss:$16 sps:$4 sm:$0xff]  }
  0xb7   :  { %960 = vmatmul.mubr.bf16.vlgmr.msra.gmra.mrb[0].mxu0 %v2765_v5  ;;  %1042 = vmatmul.mubr.bf16.vlgmr.msra.gmra.mrb[0].mxu1 %v2765_v5  ;;  %v3421_v5 = vld [vmem:[#allocation4 + $0x1e8] ss:$16 sps:$4 sm:$0xff]  }
  0xb8   :  { %2046 = vmatpush1.bf16.msra.mxu0 %v3328_v8  ;;  %2128 = vmatpush1.bf16.msra.mxu1 %v3331_v9  ;;  %v212_v8 = vlaneseq }
  0xb9   :  { %2047 = vmatprep.subr.bf16.mxu0 %v3336_v10  ;;  %2129 = vmatprep.subr.bf16.mxu1 %v3339_v11 }
  0xba   :  { %v3761_v9 = vshrl.u32 %v212_v8, 7 }
  0xbc   :  { %2048 = vmatpush1.bf16.msra.mxu0 %v3334_v12  ;;  %2130 = vmatpush1.bf16.msra.mxu1 %v3337_v13  ;;  %v3764_v10 = vsub.s32 0, %v3761_v9  ;;  %v3767_v11 = vsub.s32 2, %v3761_v9  ;;  %v210_v12 = vld [vmem:[%s3921_s2] sm:$0xf]  ;;  %v3773_v13 = vsub.s32 1, %v3761_v9 }
  0xbd   :  { %2049 = vmatprep.subr.bf16.mxu0 %v3342_v14  ;;  %2131 = vmatprep.subr.bf16.mxu1 %v3345_v15  ;;  %v3776_v14 = vsub.s32 3, %v3761_v9 }
  0xbe   :  { %v215_v15 = vrot.slane %v210_v12, %v3764_v10 }
  0xc0   :  { %2050 = vmatpush1.bf16.msra.mxu0 %v3340_v16  ;;  %2132 = vmatpush1.bf16.msra.mxu1 %v3343_v17  ;;  %v223_v16 = vrot.slane %v210_v12, %v3767_v11  ;;  %v219_v17 = vrot.slane %v210_v12, %v3773_v13 }
  0xc1   :  { %2051 = vmatprep.subr.bf16.mxu0 %v3348_v18  ;;  %2133 = vmatprep.subr.bf16.mxu1 %v3351_v19  ;;  %v227_v18 = vrot.slane %v210_v12, %v3776_v14 }
  0xc4   :  { %2052 = vmatpush1.bf16.msra.mxu0 %v3346_v20  ;;  %2134 = vmatpush1.bf16.msra.mxu1 %v3349_v21 }
  0xc5   :  { %2053 = vmatprep.subr.bf16.mxu0 %v3354_v22  ;;  %2135 = vmatprep.subr.bf16.mxu1 %v3357_v23 }
  0xc8   :  { %2054 = vmatpush1.bf16.msra.mxu0 %v3352_v24  ;;  %2136 = vmatpush1.bf16.msra.mxu1 %v3355_v25 }
  0xc9   :  { %2055 = vmatprep.subr.bf16.mxu0 %v3360_v26  ;;  %2137 = vmatprep.subr.bf16.mxu1 %v3363_v27 }
  0xcc   :  { %2056 = vmatpush1.bf16.msra.mxu0 %v3358_v28  ;;  %2138 = vmatpush1.bf16.msra.mxu1 %v3361_v29 }
  0xcd   :  { %2057 = vmatprep.subr.bf16.mxu0 %v3366_v30  ;;  %2139 = vmatprep.subr.bf16.mxu1 %v3369_v31 }
  0xd0   :  { %2058 = vmatpush1.bf16.msra.mxu0 %v3364_v32  ;;  %2140 = vmatpush1.bf16.msra.mxu1 %v3367_v33 }
  0xd1   :  { %2059 = vmatprep.subr.bf16.mxu0 %v3372_v34  ;;  %2141 = vmatprep.subr.bf16.mxu1 %v3375_v35 }
  0xd4   :  { %2060 = vmatpush1.bf16.msra.mxu0 %v3370_v36  ;;  %2142 = vmatpush1.bf16.msra.mxu1 %v3373_v37 }
  0xd5   :  { %2061 = vmatprep.subr.bf16.mxu0 %v3378_v38  ;;  %2143 = vmatprep.subr.bf16.mxu1 %v3381_v39 }
  0xd8   :  { %2062 = vmatpush1.bf16.msra.mxu0 %v3376_v40  ;;  %2144 = vmatpush1.bf16.msra.mxu1 %v3379_v41 }
  0xd9   :  { %2063 = vmatprep.subr.bf16.mxu0 %v3384_v42  ;;  %2145 = vmatprep.subr.bf16.mxu1 %v3387_v43 }
  0xdc   :  { %2064 = vmatpush1.bf16.msra.mxu0 %v3382_v44  ;;  %2146 = vmatpush1.bf16.msra.mxu1 %v3385_v45 }
  0xdd   :  { %2065 = vmatprep.subr.bf16.mxu0 %v3390_v46  ;;  %2147 = vmatprep.subr.bf16.mxu1 %v3393_v47 }
  0xe0   :  { %2066 = vmatpush1.bf16.msra.mxu0 %v3388_v48  ;;  %2148 = vmatpush1.bf16.msra.mxu1 %v3391_v49 }
  0xe1   :  { %2067 = vmatprep.subr.bf16.mxu0 %v3396_v50  ;;  %2149 = vmatprep.subr.bf16.mxu1 %v3399_v51 }
  0xe4   :  { %2068 = vmatpush1.bf16.msra.mxu0 %v3394_v52  ;;  %2150 = vmatpush1.bf16.msra.mxu1 %v3397_v53 }
  0xe5   :  { %2069 = vmatprep.subr.bf16.mxu0 %v3402_v54  ;;  %2151 = vmatprep.subr.bf16.mxu1 %v3405_v55 }
  0xe8   :  { %2070 = vmatpush1.bf16.msra.mxu0 %v3400_v56  ;;  %2152 = vmatpush1.bf16.msra.mxu1 %v3403_v57 }
  0xe9   :  { %2071 = vmatprep.subr.bf16.mxu0 %v3408_v58  ;;  %2153 = vmatprep.subr.bf16.mxu1 %v3411_v59 }
  0xec   :  { %2072 = vmatpush1.bf16.msra.mxu0 %v3406_v60  ;;  %2154 = vmatpush1.bf16.msra.mxu1 %v3409_v61 }
  0xed   :  { %2073 = vmatprep.subr.bf16.mxu0 %v3414_v62  ;;  %2155 = vmatprep.subr.bf16.mxu1 %v3417_v63 }
  0xf0   :  { %2074 = vmatpush1.bf16.msra.mxu0 %v3412_v0  ;;  %2156 = vmatpush1.bf16.msra.mxu1 %v3415_v1 }
  0xf1   :  { %2075 = vmatprep.subr.bf16.mxu0 %v3420_v2  ;;  %2157 = vmatprep.subr.bf16.mxu1 %v3423_v3 }
  0xf4   :  { %2076 = vmatpush1.bf16.msra.mxu0 %v3418_v4  ;;  %2158 = vmatpush1.bf16.msra.mxu1 %v3421_v5 }
  0xf5   :  { %2086 = vmatprep.subr.bf16.mxu0 %v3426_v6  ;;  %2168 = vmatprep.subr.bf16.mxu1 %v3429_v7 }
 0x18a   :  { %v961_v19 = vpop.f32.mrb[0].mxu0  ;;  %v1043_v20 = vpop.f32.mrb[0].mxu1 }
 0x18b   :  { %v3782_v21 = vadd.f32 %v961_v19, %v215_v15  ;;  %v3784_v22 = vadd.f32 %v1043_v20, %v223_v16  ;;  %v963_v23 = vpop.f32.mrb[1].mxu0  ;;  %v1045_v24 = vpop.f32.mrb[1].mxu1 }
 0x18c   :  { %v3786_v25 = vadd.f32 %v963_v23, %v219_v17  ;;  %v3788_v26 = vadd.f32 %v1045_v24, %v227_v18  ;;  %v965_v27 = vpop.f32.mrb[2].mxu0  ;;  %v1047_v28 = vpop.f32.mrb[2].mxu1 }
 0x18d   :  { %v1052_v29 = vrot.slane %v3782_v21, 4  ;;  %v1064_v30 = vrot.slane %v3784_v22, 4  ;;  %v966_v31 = vpop.f32.mrb[3].mxu0  ;;  %v1048_v32 = vpop.f32.mrb[3].mxu1 }
 0x18e   :  { %v1058_v33 = vrot.slane %v3786_v25, 4  ;;  %v1070_v34 = vrot.slane %v3788_v26, 4 }
 0x18f   :  { %v1053_v35 = vadd.f32 %v3782_v21, %v1052_v29  ;;  %v1065_v36 = vadd.f32 %v3784_v22, %v1064_v30 }
 0x190   :  { %v1059_v37 = vadd.f32 %v3786_v25, %v1058_v33  ;;  %v1071_v38 = vadd.f32 %v3788_v26, %v1070_v34 }
 0x191   :  { %v1054_v39 = vrot.slane %v1053_v35, 2  ;;  %v1066_v40 = vrot.slane %v1065_v36, 2 }
 0x192   :  { %v1060_v41 = vrot.slane %v1059_v37, 2  ;;  %v1072_v42 = vrot.slane %v1071_v38, 2 }
 0x193   :  { %v1055_v43 = vadd.f32 %v1054_v39, %v1053_v35  ;;  %v1067_v44 = vadd.f32 %v1066_v40, %v1065_v36 }
 0x194   :  { %v1061_v45 = vadd.f32 %v1060_v41, %v1059_v37  ;;  %v1073_v46 = vadd.f32 %v1072_v42, %v1071_v38 }
 0x195   :  { %v1056_v47 = vrot.slane %v1055_v43, 1  ;;  %v1068_v48 = vrot.slane %v1067_v44, 1 }
 0x196   :  { %v1062_v49 = vrot.slane %v1061_v45, 1  ;;  %v1074_v50 = vrot.slane %v1073_v46, 1 }
 0x197   :  { %v1057_v51 = vadd.f32 %v1056_v47, %v1055_v43  ;;  %v1069_v52 = vadd.f32 %v1068_v48, %v1067_v44  ;;  %v3645_v44 = vmov 1966171168  }
 0x198   :  { %v1063_v53 = vadd.f32 %v1062_v49, %v1061_v45  ;;  %v1075_v54 = vadd.f32 %v1074_v50, %v1073_v46  ;;  %v1132_v45 = vunpack.c.l.s4 %v3645_v44  ;;  %v3441_v44 = vld [vmem:[#allocation4 + $0x24c] ss:$16 sps:$4 sm:$0xff]  }
 0x199   :  { %v3798_v55 = vmul.f32 0.125, %v1057_v51  ;;  %v3800_v56 = vmul.f32 0.125, %v1069_v52 }
 0x19a   :  { %v3802_v57 = vmul.f32 0.125, %v1063_v53  ;;  %v3804_v58 = vmul.f32 0.125, %v1075_v54  ;;  %v1133_v46 = vunpack.c.0.s8 %v1132_v45  ;;  %v3436_v45 = vld [vmem:[#allocation4 + $0x240] ss:$16 sps:$4 sm:$0xff]  }
 0x19b   :  { %v1081_v59 = vsub.f32 %v3782_v21, %v3798_v55  ;;  %v1083_v60 = vsub.f32 %v3784_v22, %v3800_v56 }
 0x19c   :  { %v1082_v61 = vsub.f32 %v3786_v25, %v3802_v57  ;;  %v1084_v62 = vsub.f32 %v3788_v26, %v3804_v58  ;;  %v3815_v49 = vsub.s32 %v1133_v46, %v3761_v9  ;;  %v3439_v46 = vld [vmem:[#allocation4 + $0x248] ss:$16 sps:$4 sm:$0xff]  }
 0x19d   :  { %v1085_v63 = vmul.f32 %v1081_v59, %v1081_v59  ;;  %v1087_v0 = vmul.f32 %v1083_v60, %v1083_v60 }
 0x19e   :  { %v1086_v1 = vmul.f32 %v1082_v61, %v1082_v61  ;;  %v1088_v2 = vmul.f32 %v1084_v62, %v1084_v62  ;;  %v1050_v61 = vld [vmem:[%s3922_s3] sm:$0xf] }
 0x19f   :  { %v1089_v3 = vrot.slane %v1085_v63, 4  ;;  %v1101_v4 = vrot.slane %v1087_v0, 4 }
 0x1a0   :  { %v1095_v5 = vrot.slane %v1086_v1, 4  ;;  %v1107_v6 = vrot.slane %v1088_v2, 4 }
 0x1a1   :  { %v1090_v7 = vadd.f32 %v1089_v3, %v1085_v63  ;;  %v1102_v8 = vadd.f32 %v1101_v4, %v1087_v0 }
 0x1a2   :  { %v1096_v12 = vadd.f32 %v1095_v5, %v1086_v1  ;;  %v1108_v15 = vadd.f32 %v1107_v6, %v1088_v2 }
 0x1a3   :  { %v1091_v16 = vrot.slane %v1090_v7, 2  ;;  %v1103_v17 = vrot.slane %v1102_v8, 2 }
 0x1a4   :  { %v1097_v18 = vrot.slane %v1096_v12, 2  ;;  %v1109_v19 = vrot.slane %v1108_v15, 2 }
 0x1a5   :  { %v1092_v20 = vadd.f32 %v1091_v16, %v1090_v7  ;;  %v1104_v23 = vadd.f32 %v1103_v17, %v1102_v8 }
 0x1a6   :  { %v1098_v24 = vadd.f32 %v1097_v18, %v1096_v12  ;;  %v1110_v27 = vadd.f32 %v1109_v19, %v1108_v15 }
 0x1a7   :  { %v1093_v28 = vrot.slane %v1092_v20, 1  ;;  %v1105_v29 = vrot.slane %v1104_v23, 1 }
 0x1a8   :  { %v1099_v30 = vrot.slane %v1098_v24, 1  ;;  %v1111_v31 = vrot.slane %v1110_v27, 1 }
 0x1a9   :  { %v1094_v32 = vadd.f32 %v1093_v28, %v1092_v20  ;;  %v1106_v33 = vadd.f32 %v1105_v29, %v1104_v23 }
 0x1aa   :  { %v1100_v34 = vadd.f32 %v1099_v30, %v1098_v24  ;;  %v1112_v35 = vadd.f32 %v1111_v31, %v1110_v27 }
 0x1ab   :  { %v1113_v36 = vmul.f32 0.125, %v1094_v32  ;;  %v1115_v37 = vmul.f32 0.125, %v1106_v33 }
 0x1ac   :  { %v1114_v38 = vmul.f32 0.125, %v1100_v34  ;;  %v1116_v39 = vmul.f32 0.125, %v1112_v35  ;;  %v3424_v34 = vld [vmem:[#allocation4 + $0x200] ss:$16 sps:$4 sm:$0xff]   ;;  %v3427_v35 = vld [vmem:[#allocation4 + $0x208] ss:$16 sps:$4 sm:$0xff]  }
 0x1ad   :  { %v1117_v40 = vadd.f32 1e-05, %v1113_v36  ;;  %v1119_v41 = vadd.f32 1e-05, %v1115_v37 }
 0x1ae   :  { %v1118_v42 = vadd.f32 1e-05, %v1114_v38  ;;  %v1120_v43 = vadd.f32 1e-05, %v1116_v39  ;;  %v3432_v38 = vld [vmem:[#allocation4 + $0x224] ss:$16 sps:$4 sm:$0xff]  }
 0x1af   :  { %3552 = vrsqrt.f32 %v1117_v40  ;;  %v3435_v39 = vld [vmem:[#allocation4 + $0x22c] ss:$16 sps:$4 sm:$0xff]  }
 0x1b0   :  { %3554 = vrsqrt.f32 %v1119_v41  ;;  %v3430_v41 = vld [vmem:[#allocation4 + $0x220] ss:$16 sps:$4 sm:$0xff]  }
 0x1b1   :  { %3556 = vrsqrt.f32 %v1118_v42  ;;  %v3433_v42 = vld [vmem:[#allocation4 + $0x228] ss:$16 sps:$4 sm:$0xff]  }
 0x1b2   :  { %3558 = vrsqrt.f32 %v1120_v43  ;;  %v3438_v43 = vld [vmem:[#allocation4 + $0x244] ss:$16 sps:$4 sm:$0xff]  }
 0x1b9   :  { %v3553_v47 = vpop.eup %3552 }
 0x1ba   :  { %v3555_v48 = vpop.eup %3554 }
 0x1bb   :  { %v3557_v50 = vpop.eup %3556 }
 0x1bc   :  { %v3559_v51 = vpop.eup %3558  ;;  %v1129_v52 = vcombine.low %v3553_v47, %v3557_v50  ;;  %v3444_v47 = vld [vmem:[#allocation4 + $0x264] ss:$16 sps:$4 sm:$0xff]   ;;  %v3442_v50 = vld [vmem:[#allocation4 + $0x260] ss:$16 sps:$4 sm:$0xff]  }
 0x1bd   :  { %v1130_v53 = vcombine.low %v3555_v48, %v3559_v51  ;;  %v3447_v48 = vld [vmem:[#allocation4 + $0x26c] ss:$16 sps:$4 sm:$0xff]   ;;  %v3445_v51 = vld [vmem:[#allocation4 + $0x268] ss:$16 sps:$4 sm:$0xff]  }
 0x1be   :  { %v1137_v54 = vrot.slane %v1129_v52, %v3815_v49  ;;  %v3450_v52 = vld [vmem:[#allocation4 + $0x284] ss:$16 sps:$4 sm:$0xff]  }
 0x1bf   :  { %v1144_v59 = vrot.slane %v1130_v53, %v3815_v49  ;;  %v3453_v53 = vld [vmem:[#allocation4 + $0x28c] ss:$16 sps:$4 sm:$0xff]  }
 0x1c1   :  { %v1145_v60 = vcombine.low %v1137_v54, %v1144_v59  ;;  %v3448_v54 = vld [vmem:[#allocation4 + $0x280] ss:$16 sps:$4 sm:$0xff]   ;;  %v3451_v59 = vld [vmem:[#allocation4 + $0x288] ss:$16 sps:$4 sm:$0xff]  }
 0x1c3   :  { %v1152_v62 = vrot.slane %v1145_v60, %v3815_v49  ;;  %v3456_v60 = vld [vmem:[#allocation4 + $0x2a4] ss:$16 sps:$4 sm:$0xff]  }
 0x1c5   :  { %v1154_v63 = vmul.f32 %v1152_v62, %v1050_v61  ;;  %v3459_v61 = vld [vmem:[#allocation4 + $0x2ac] ss:$16 sps:$4 sm:$0xff]   ;;  %v3454_v62 = vld [vmem:[#allocation4 + $0x2a0] ss:$16 sps:$4 sm:$0xff]  }
 0x1c7   :  { %v1167_v0 = vrot.slane %v1154_v63, %v3767_v11  ;;  %v1171_v9 = vrot.slane %v1154_v63, %v3776_v14  ;;  %v1159_v1 = vrot.slane %v1154_v63, %v3764_v10  ;;  %v1163_v2 = vrot.slane %v1154_v63, %v3773_v13  ;;  %v3457_v63 = vld [vmem:[#allocation4 + $0x2a8] ss:$16 sps:$4 sm:$0xff]  }
 0x1c9   :  { %v1178_v3 = vmul.f32 %v1167_v0, %v3800_v56  ;;  %v1179_v4 = vmul.f32 %v1171_v9, %v3804_v58  ;;  %v1213_v5 = vmul.f32 %v3788_v26, %v1171_v9  ;;  %v1176_v6 = vmul.f32 %v1159_v1, %v3798_v55  ;;  %v1051_v26 = vld [vmem:[%s3923_s4] sm:$0xf]  ;;  %v3465_v9 = vld [vmem:[#allocation4 + $0x2cc] ss:$16 sps:$4 sm:$0xff]  }
 0x1ca   :  { %v1177_v7 = vmul.f32 %v1163_v2, %v3802_v57  ;;  %v1211_v8 = vmul.f32 %v3786_v25, %v1163_v2  ;;  %v1210_v12 = vmul.f32 %v3782_v21, %v1159_v1  ;;  %v1212_v15 = vmul.f32 %v3784_v22, %v1167_v0  ;;  %v3462_v0 = vld [vmem:[#allocation4 + $0x2c4] ss:$16 sps:$4 sm:$0xff]   ;;  %v3460_v1 = vld [vmem:[#allocation4 + $0x2c0] ss:$16 sps:$4 sm:$0xff]   ;;  %v3463_v2 = vld [vmem:[#allocation4 + $0x2c8] ss:$16 sps:$4 sm:$0xff]  }
 0x1cb   :  { %v1185_v16 = vcombine.low %v1178_v3, %v1179_v4  ;;  %v3468_v3 = vld [vmem:[#allocation4 + $0x2e4] ss:$16 sps:$4 sm:$0xff]   ;;  %v3471_v4 = vld [vmem:[#allocation4 + $0x2ec] ss:$16 sps:$4 sm:$0xff]  }
 0x1cc   :  { %v1184_v17 = vcombine.low %v1176_v6, %v1177_v7  ;;  %v3469_v6 = vld [vmem:[#allocation4 + $0x2e8] ss:$16 sps:$4 sm:$0xff]   ;;  %v3474_v7 = vld [vmem:[#allocation4 + $0x304] ss:$16 sps:$4 sm:$0xff]  }
 0x1cd   :  { %v1199_v18 = vrot.slane %v1185_v16, %v3815_v49  ;;  %v3480_v16 = vld [vmem:[#allocation4 + $0x324] ss:$16 sps:$4 sm:$0xff]  }
 0x1ce   :  { %v1192_v56 = vrot.slane %v1184_v17, %v3815_v49  ;;  %v3483_v17 = vld [vmem:[#allocation4 + $0x32c] ss:$16 sps:$4 sm:$0xff]  }
 0x1d0   :  { %v1200_v19 = vcombine.low %v1192_v56, %v1199_v18  ;;  %v3478_v18 = vld [vmem:[#allocation4 + $0x320] ss:$16 sps:$4 sm:$0xff]   ;;  %v3481_v56 = vld [vmem:[#allocation4 + $0x328] ss:$16 sps:$4 sm:$0xff]  }
 0x1d2   :  { %v1207_v55 = vrot.slane %v1200_v19, %v3815_v49  ;;  %v3486_v19 = vld [vmem:[#allocation4 + $0x344] ss:$16 sps:$4 sm:$0xff]  }
 0x1d4   :  { %v1209_v57 = vsub.f32 %v1051_v26, %v1207_v55  ;;  %v3489_v26 = vld [vmem:[#allocation4 + $0x34c] ss:$16 sps:$4 sm:$0xff]   ;;  %v3484_v55 = vld [vmem:[#allocation4 + $0x340] ss:$16 sps:$4 sm:$0xff]  }
 0x1d6   :  { %v1222_v25 = vrot.slane %v1209_v57, %v3773_v13  ;;  %v1218_v21 = vrot.slane %v1209_v57, %v3764_v10  ;;  %v1230_v22 = vrot.slane %v1209_v57, %v3776_v14  ;;  %v1226_v58 = vrot.slane %v1209_v57, %v3767_v11  ;;  %v3487_v57 = vld [vmem:[#allocation4 + $0x348] ss:$16 sps:$4 sm:$0xff]  }
 0x1d8   :  { %v1236_v20 = vadd.f32 %v1222_v25, %v1211_v8  ;;  %v1235_v23 = vadd.f32 %v1218_v21, %v1210_v12  ;;  %v1238_v24 = vadd.f32 %v1230_v22, %v1213_v5  ;;  %v3845_v27 = vadd.f32 %v1226_v58, %v1212_v15  ;;  %v3466_v5 = vld [vmem:[#allocation4 + $0x2e0] ss:$16 sps:$4 sm:$0xff]   ;;  %v3477_v8 = vld [vmem:[#allocation4 + $0x30c] ss:$16 sps:$4 sm:$0xff]   ;;  %v3475_v15 = vld [vmem:[#allocation4 + $0x308] ss:$16 sps:$4 sm:$0xff]  }
 0x1d9   :  { %v3472_v12 = vld [vmem:[#allocation4 + $0x300] ss:$16 sps:$4 sm:$0xff]   ;;  %v3492_v25 = vld [vmem:[#allocation4 + $0x364] ss:$16 sps:$4 sm:$0xff]   ;;  %v3495_v21 = vld [vmem:[#allocation4 + $0x36c] ss:$16 sps:$4 sm:$0xff]  }
 0x1da   :  { %vm1240_vm0 = vcmp.gt.f32.partialorder %v1236_v20, 0.0  ;;  %v1244_v28 = vmul.f32 0.01, %v1236_v20  ;;  %vm1239_vm1 = vcmp.gt.f32.partialorder %v1235_v23, 0.0  ;;  %v1243_v29 = vmul.f32 0.01, %v1235_v23 }
 0x1db   :  { %vm1242_vm2 = vcmp.gt.f32.partialorder %v1238_v24, 0.0  ;;  %v1246_v30 = vmul.f32 0.01, %v1238_v24  ;;  %v3490_v22 = vld [vmem:[#allocation4 + $0x360] ss:$16 sps:$4 sm:$0xff]   ;;  %vm1241_vm3 = vcmp.gt.f32.partialorder %v3845_v27, 0.0 }
 0x1dc   :  { %v1248_v31 = vsel %vm1240_vm0, %v1236_v20, %v1244_v28  ;;  %v1247_v32 = vsel %vm1239_vm1, %v1235_v23, %v1243_v29  ;;  %v3493_v58 = vld [vmem:[#allocation4 + $0x368] ss:$16 sps:$4 sm:$0xff]   ;;  %v3498_v20 = vld [vmem:[#allocation4 + $0x384] ss:$16 sps:$4 sm:$0xff]   ;;  %v3501_v23 = vld [vmem:[#allocation4 + $0x38c] ss:$16 sps:$4 sm:$0xff]  }
 0x1dd   :  { %v1252_v33 = vpack.c.bf16 %v1248_v31, %v1248_v31  ;;  %v1251_v36 = vpack.c.bf16 %v1247_v32, %v1247_v32  ;;  %v1250_v37 = vsel %vm1242_vm2, %v1238_v24, %v1246_v30  ;;  %v3496_v24 = vld [vmem:[#allocation4 + $0x380] ss:$16 sps:$4 sm:$0xff]   ;;  %v3499_v28 = vld [vmem:[#allocation4 + $0x388] ss:$16 sps:$4 sm:$0xff]   ;;  %v3504_v29 = vld [vmem:[#allocation4 + $0x3a4] ss:$16 sps:$4 sm:$0xff]  }
 0x1de   :  { %v1254_v40 = vpack.c.bf16 %v1250_v37, %v1250_v37  ;;  %v3507_v30 = vld [vmem:[#allocation4 + $0x3ac] ss:$16 sps:$4 sm:$0xff]   ;;  %v3502_v31 = vld [vmem:[#allocation4 + $0x3a0] ss:$16 sps:$4 sm:$0xff]   ;;  %v3505_v32 = vld [vmem:[#allocation4 + $0x3a8] ss:$16 sps:$4 sm:$0xff]  }
 0x1df   :  { %2077 = vmatprep.mubr.bf16.mxu0 %v1252_v33  ;;  %2159 = vmatprep.mubr.bf16.mxu1 %v1252_v33  ;;  %v3510_v33 = vld [vmem:[#allocation4 + $0x3c4] ss:$16 sps:$4 sm:$0xff]  }
 0x1e0   :  { %2078 = vmatmul.mubr.bf16.vlgmr.msra.gmra.mrb[4].mxu0 %v1251_v36  ;;  %2160 = vmatmul.mubr.bf16.vlgmr.msra.gmra.mrb[4].mxu1 %v1251_v36  ;;  %v3511_v36 = vld [vmem:[#allocation4 + $0x3c8] ss:$16 sps:$4 sm:$0xff]   ;;  %v3516_v37 = vld [vmem:[#allocation4 + $0x3e4] ss:$16 sps:$4 sm:$0xff]  }
 0x1e1   :  { %2087 = vmatpush1.bf16.msra.mxu0 %v3424_v34  ;;  %2169 = vmatpush1.bf16.msra.mxu1 %v3427_v35  ;;  %v3513_v34 = vld [vmem:[#allocation4 + $0x3cc] ss:$16 sps:$4 sm:$0xff]   ;;  %v3508_v35 = vld [vmem:[#allocation4 + $0x3c0] ss:$16 sps:$4 sm:$0xff]  }
 0x1e2   :  { %2118 = vmatprep.mubr.bf16.mxu0 %v1254_v40  ;;  %2200 = vmatprep.mubr.bf16.mxu1 %v1254_v40  ;;  %v3514_v40 = vld [vmem:[#allocation4 + $0x3e0] ss:$16 sps:$4 sm:$0xff]  }
 0x1e3   :  { %2088 = vmatprep.subr.bf16.mxu0 %v3432_v38  ;;  %2170 = vmatprep.subr.bf16.mxu1 %v3435_v39  ;;  %v3519_v38 = vld [vmem:[#allocation4 + $0x3ec] ss:$16 sps:$4 sm:$0xff]   ;;  %v1245_v39 = vmul.f32 0.01, %v3845_v27 }
 0x1e5   :  { %2089 = vmatpush1.bf16.msra.mxu0 %v3430_v41  ;;  %2171 = vmatpush1.bf16.msra.mxu1 %v3433_v42  ;;  %v3517_v41 = vld [vmem:[#allocation4 + $0x3e8] ss:$16 sps:$4 sm:$0xff]   ;;  %v1249_v42 = vsel %vm1241_vm3, %v3845_v27, %v1245_v39  ;;  %v3528_v27 = vld [vmem:[#allocation6 + $0x50] sm:$0xff]  }
 0x1e6   :  { %2090 = vmatprep.subr.bf16.mxu0 %v3438_v43  ;;  %2172 = vmatprep.subr.bf16.mxu1 %v3441_v44  ;;  %v1253_v43 = vpack.c.bf16 %v1249_v42, %v1249_v42  ;;  %v3520_v44 = vld [vmem:[#allocation6 + $0x40] sm:$0xff]  }
 0x1e9   :  { %2091 = vmatpush1.bf16.msra.mxu0 %v3436_v45  ;;  %2173 = vmatpush1.bf16.msra.mxu1 %v3439_v46  ;;  %v3521_v45 = vld [vmem:[#allocation6 + $0xc0] sm:$0xff]  }
 0x1ea   :  { %2092 = vmatprep.subr.bf16.mxu0 %v3444_v47  ;;  %2174 = vmatprep.subr.bf16.mxu1 %v3447_v48  ;;  %v3522_v46 = vld [vmem:[#allocation6] sm:$0xff]   ;;  %v3524_v48 = vld [vmem:[#allocation6 + $0x48] sm:$0xff]  }
 0x1eb   :  { %v3523_v47 = vld [vmem:[#allocation6 + $0x80] sm:$0xff]  }
 0x1ed   :  { %2093 = vmatpush1.bf16.msra.mxu0 %v3442_v50  ;;  %2175 = vmatpush1.bf16.msra.mxu1 %v3445_v51  ;;  %v3525_v50 = vld [vmem:[#allocation6 + $0xc8] sm:$0xff]  }
 0x1ee   :  { %2094 = vmatprep.subr.bf16.mxu0 %v3450_v52  ;;  %2176 = vmatprep.subr.bf16.mxu1 %v3453_v53  ;;  %v3526_v51 = vld [vmem:[#allocation6 + $0x8] sm:$0xff]   ;;  %v3529_v53 = vld [vmem:[#allocation6 + $0xd0] sm:$0xff]  }
 0x1ef   :  { %v3527_v52 = vld [vmem:[#allocation6 + $0x88] sm:$0xff]  }
 0x1f1   :  { %2095 = vmatpush1.bf16.msra.mxu0 %v3448_v54  ;;  %2177 = vmatpush1.bf16.msra.mxu1 %v3451_v59  ;;  %v3530_v54 = vld [vmem:[#allocation6 + $0x10] sm:$0xff]  }
 0x1f2   :  { %2096 = vmatprep.subr.bf16.mxu0 %v3456_v60  ;;  %2178 = vmatprep.subr.bf16.mxu1 %v3459_v61  ;;  %v3531_v59 = vld [vmem:[#allocation6 + $0x90] sm:$0xff]   ;;  %v3532_v60 = vld [vmem:[#allocation6 + $0x58] sm:$0xff]  }
 0x1f3   :  { %v3533_v61 = vld [vmem:[#allocation6 + $0xd8] sm:$0xff]  }
 0x1f5   :  { %2097 = vmatpush1.bf16.msra.mxu0 %v3454_v62  ;;  %2179 = vmatpush1.bf16.msra.mxu1 %v3457_v63  ;;  %v3534_v62 = vld [vmem:[#allocation6 + $0x18] sm:$0xff]  }
 0x1f6   :  { %2098 = vmatprep.subr.bf16.mxu0 %v3462_v0  ;;  %2180 = vmatprep.subr.bf16.mxu1 %v3465_v9  ;;  %v3535_v63 = vld [vmem:[#allocation6 + $0x98] sm:$0xff]   ;;  %v3536_v0 = vld [vmem:[#allocation6 + $0x60] sm:$0xff]  }
 0x1f7   :  { %v3537_v9 = vld [vmem:[#allocation6 + $0xe0] sm:$0xff]  }
 0x1f9   :  { %2099 = vmatpush1.bf16.msra.mxu0 %v3460_v1  ;;  %2181 = vmatpush1.bf16.msra.mxu1 %v3463_v2  ;;  %v3538_v1 = vld [vmem:[#allocation6 + $0x20] sm:$0xff]  }
 0x1fa   :  { %2100 = vmatprep.subr.bf16.mxu0 %v3468_v3  ;;  %2182 = vmatprep.subr.bf16.mxu1 %v3471_v4  ;;  %v3539_v2 = vld [vmem:[#allocation6 + $0xa0] sm:$0xff]   ;;  %v3540_v3 = vld [vmem:[#allocation6 + $0x68] sm:$0xff]  }
 0x1fb   :  { %v3541_v4 = vld [vmem:[#allocation6 + $0xe8] sm:$0xff]  }
 0x1fd   :  { %2101 = vmatpush1.bf16.msra.mxu0 %v3466_v5  ;;  %2183 = vmatpush1.bf16.msra.mxu1 %v3469_v6  ;;  %v3542_v5 = vld [vmem:[#allocation6 + $0x28] sm:$0xff]  }
 0x1fe   :  { %2102 = vmatprep.subr.bf16.mxu0 %v3474_v7  ;;  %2184 = vmatprep.subr.bf16.mxu1 %v3477_v8  ;;  %v3543_v6 = vld [vmem:[#allocation6 + $0xa8] sm:$0xff]   ;;  %v3544_v7 = vld [vmem:[#allocation6 + $0x70] sm:$0xff]  }
 0x1ff   :  { %v3545_v8 = vld [vmem:[#allocation6 + $0xf0] sm:$0xff]  }
 0x201   :  { %2103 = vmatpush1.bf16.msra.mxu0 %v3472_v12  ;;  %2185 = vmatpush1.bf16.msra.mxu1 %v3475_v15  ;;  %v3546_v12 = vld [vmem:[#allocation6 + $0x30] sm:$0xff]  }
 0x202   :  { %2104 = vmatprep.subr.bf16.mxu0 %v3480_v16  ;;  %2186 = vmatprep.subr.bf16.mxu1 %v3483_v17  ;;  %v3547_v15 = vld [vmem:[#allocation6 + $0xb0] sm:$0xff]   ;;  %v3548_v16 = vld [vmem:[#allocation6 + $0x78] sm:$0xff]  }
 0x203   :  { %v3549_v17 = vld [vmem:[#allocation6 + $0xf8] sm:$0xff]  }
 0x205   :  { %2105 = vmatpush1.bf16.msra.mxu0 %v3478_v18  ;;  %2187 = vmatpush1.bf16.msra.mxu1 %v3481_v56  ;;  %v3550_v18 = vld [vmem:[#allocation6 + $0x38] sm:$0xff]  }
 0x206   :  { %2106 = vmatprep.subr.bf16.mxu0 %v3486_v19  ;;  %2188 = vmatprep.subr.bf16.mxu1 %v3489_v26  ;;  %v3551_v56 = vld [vmem:[#allocation6 + $0xb8] sm:$0xff]   ;;  %v1383_v19 = vld [vmem:[%s3925_s6] sm:$0xf] }
 0x207   :  { %v1388_v26 = vrot.slane %v1383_v19, %v3764_v10 }
 0x209   :  { %2107 = vmatpush1.bf16.msra.mxu0 %v3484_v55  ;;  %2189 = vmatpush1.bf16.msra.mxu1 %v3487_v57  ;;  %v1396_v55 = vrot.slane %v1383_v19, %v3767_v11  ;;  %v1392_v57 = vrot.slane %v1383_v19, %v3773_v13 }
 0x20a   :  { %2108 = vmatprep.subr.bf16.mxu0 %v3492_v25  ;;  %2190 = vmatprep.subr.bf16.mxu1 %v3495_v21  ;;  %v1400_v25 = vrot.slane %v1383_v19, %v3776_v14 }
 0x20d   :  { %2109 = vmatpush1.bf16.msra.mxu0 %v3490_v22  ;;  %2191 = vmatpush1.bf16.msra.mxu1 %v3493_v58 }
 0x20e   :  { %2110 = vmatprep.subr.bf16.mxu0 %v3498_v20  ;;  %2192 = vmatprep.subr.bf16.mxu1 %v3501_v23 }
 0x211   :  { %2111 = vmatpush1.bf16.msra.mxu0 %v3496_v24  ;;  %2193 = vmatpush1.bf16.msra.mxu1 %v3499_v28 }
 0x212   :  { %2112 = vmatprep.subr.bf16.mxu0 %v3504_v29  ;;  %2194 = vmatprep.subr.bf16.mxu1 %v3507_v30 }
 0x215   :  { %2113 = vmatpush1.bf16.msra.mxu0 %v3502_v31  ;;  %2195 = vmatpush1.bf16.msra.mxu1 %v3505_v32 }
 0x216   :  { %2114 = vmatprep.subr.bf16.mxu0 %v3510_v33  ;;  %2196 = vmatprep.subr.bf16.mxu1 %v3513_v34 }
 0x219   :  { %2115 = vmatpush1.bf16.msra.mxu0 %v3508_v35  ;;  %2197 = vmatpush1.bf16.msra.mxu1 %v3511_v36 }
 0x21a   :  { %2116 = vmatprep.subr.bf16.mxu0 %v3516_v37  ;;  %2198 = vmatprep.subr.bf16.mxu1 %v3519_v38 }
 0x21d   :  { %2117 = vmatpush1.bf16.msra.mxu0 %v3514_v40  ;;  %2199 = vmatpush1.bf16.msra.mxu1 %v3517_v41 }
 0x21e   :  { %3056 = vmatprep.subr.bf16.mxu0 %v3520_v44  ;;  %3078 = vmatprep.subr.bf16.mxu1 %v3521_v45 }
 0x220   :  { %2119 = vmatmul.mubr.bf16.vlgmr.msra.gmra.mrb[4].mxu0 %v1253_v43  ;;  %2201 = vmatmul.mubr.bf16.vlgmr.msra.gmra.mrb[4].mxu1 %v1253_v43 }
 0x221   :  { %3057 = vmatpush3.bf16.msra.mxu0 %v3522_v46  ;;  %3079 = vmatpush3.bf16.msra.mxu1 %v3523_v47 }
 0x222   :  { %3058 = vmatprep.subr.bf16.mxu0 %v3524_v48  ;;  %3080 = vmatprep.subr.bf16.mxu1 %v3525_v50 }
 0x225   :  { %3059 = vmatpush3.bf16.msra.mxu0 %v3526_v51  ;;  %3081 = vmatpush3.bf16.msra.mxu1 %v3527_v52 }
 0x226   :  { %3060 = vmatprep.subr.bf16.mxu0 %v3528_v27  ;;  %3082 = vmatprep.subr.bf16.mxu1 %v3529_v53 }
 0x229   :  { %3061 = vmatpush3.bf16.msra.mxu0 %v3530_v54  ;;  %3083 = vmatpush3.bf16.msra.mxu1 %v3531_v59 }
 0x22a   :  { %3062 = vmatprep.subr.bf16.mxu0 %v3532_v60  ;;  %3084 = vmatprep.subr.bf16.mxu1 %v3533_v61 }
 0x22d   :  { %3063 = vmatpush3.bf16.msra.mxu0 %v3534_v62  ;;  %3085 = vmatpush3.bf16.msra.mxu1 %v3535_v63 }
 0x22e   :  { %3064 = vmatprep.subr.bf16.mxu0 %v3536_v0  ;;  %3086 = vmatprep.subr.bf16.mxu1 %v3537_v9 }
 0x231   :  { %3065 = vmatpush3.bf16.msra.mxu0 %v3538_v1  ;;  %3087 = vmatpush3.bf16.msra.mxu1 %v3539_v2 }
 0x232   :  { %3066 = vmatprep.subr.bf16.mxu0 %v3540_v3  ;;  %3088 = vmatprep.subr.bf16.mxu1 %v3541_v4 }
 0x235   :  { %3067 = vmatpush3.bf16.msra.mxu0 %v3542_v5  ;;  %3089 = vmatpush3.bf16.msra.mxu1 %v3543_v6 }
 0x236   :  { %3068 = vmatprep.subr.bf16.mxu0 %v3544_v7  ;;  %3090 = vmatprep.subr.bf16.mxu1 %v3545_v8 }
 0x239   :  { %3069 = vmatpush3.bf16.msra.mxu0 %v3546_v12  ;;  %3091 = vmatpush3.bf16.msra.mxu1 %v3547_v15 }
 0x23a   :  { %3070 = vmatprep.subr.bf16.mxu0 %v3548_v16  ;;  %3092 = vmatprep.subr.bf16.mxu1 %v3549_v17 }
 0x23d   :  { %3071 = vmatpush3.bf16.msra.mxu0 %v3550_v18  ;;  %3093 = vmatpush3.bf16.msra.mxu1 %v3551_v56 }
 0x2f3   :  { %v2120_v21 = vpop.f32.mrb[4].mxu0  ;;  %v2202_v22 = vpop.f32.mrb[4].mxu1 }
 0x2f4   :  { %v3857_v58 = vadd.f32 %v2120_v21, %v1388_v26  ;;  %v3859_v20 = vadd.f32 %v2202_v22, %v1396_v55  ;;  %v2122_v23 = vpop.f32.mrb[5].mxu0  ;;  %v2204_v24 = vpop.f32.mrb[5].mxu1 }
 0x2f5   :  { %v3861_v28 = vadd.f32 %v2122_v23, %v1392_v57  ;;  %v3863_v29 = vadd.f32 %v2204_v24, %v1400_v25  ;;  %v2124_v30 = vpop.f32.mrb[6].mxu0  ;;  %v2206_v31 = vpop.f32.mrb[6].mxu1 }
 0x2f6   :  { %v2211_v32 = vrot.slane %v3857_v58, 4  ;;  %v2223_v33 = vrot.slane %v3859_v20, 4  ;;  %v2125_v34 = vpop.f32.mrb[7].mxu0  ;;  %v2207_v35 = vpop.f32.mrb[7].mxu1 }
 0x2f7   :  { %v2217_v36 = vrot.slane %v3861_v28, 4  ;;  %v2229_v37 = vrot.slane %v3863_v29, 4 }
 0x2f8   :  { %v2212_v38 = vadd.f32 %v3857_v58, %v2211_v32  ;;  %v2224_v39 = vadd.f32 %v3859_v20, %v2223_v33 }
 0x2f9   :  { %v2218_v40 = vadd.f32 %v3861_v28, %v2217_v36  ;;  %v2230_v41 = vadd.f32 %v3863_v29, %v2229_v37 }
 0x2fa   :  { %v2213_v42 = vrot.slane %v2212_v38, 2  ;;  %v2225_v43 = vrot.slane %v2224_v39, 2 }
 0x2fb   :  { %v2219_v44 = vrot.slane %v2218_v40, 2  ;;  %v2231_v45 = vrot.slane %v2230_v41, 2 }
 0x2fc   :  { %v2214_v46 = vadd.f32 %v2213_v42, %v2212_v38  ;;  %v2226_v47 = vadd.f32 %v2225_v43, %v2224_v39 }
 0x2fd   :  { %v2220_v48 = vadd.f32 %v2219_v44, %v2218_v40  ;;  %v2232_v50 = vadd.f32 %v2231_v45, %v2230_v41 }
 0x2fe   :  { %v2215_v51 = vrot.slane %v2214_v46, 1  ;;  %v2227_v52 = vrot.slane %v2226_v47, 1 }
 0x2ff   :  { %v2221_v27 = vrot.slane %v2220_v48, 1  ;;  %v2233_v53 = vrot.slane %v2232_v50, 1 }
 0x300   :  { %v2216_v54 = vadd.f32 %v2215_v51, %v2214_v46  ;;  %v2228_v59 = vadd.f32 %v2227_v52, %v2226_v47 }
 0x301   :  { %v2222_v60 = vadd.f32 %v2221_v27, %v2220_v48  ;;  %v2234_v61 = vadd.f32 %v2233_v53, %v2232_v50 }
 0x302   :  { %v3873_v62 = vmul.f32 0.125, %v2216_v54  ;;  %v3875_v63 = vmul.f32 0.125, %v2228_v59 }
 0x303   :  { %v3877_v0 = vmul.f32 0.125, %v2222_v60  ;;  %v2238_v9 = vmul.f32 0.125, %v2234_v61  ;;  %v2209_v60 = vld [vmem:[%s3926_s7] sm:$0xf] }
 0x304   :  { %v2239_v1 = vsub.f32 %v3857_v58, %v3873_v62  ;;  %v2241_v2 = vsub.f32 %v3859_v20, %v3875_v63 }
 0x305   :  { %v2240_v3 = vsub.f32 %v3861_v28, %v3877_v0  ;;  %v2242_v4 = vsub.f32 %v3863_v29, %v2238_v9 }
 0x306   :  { %v2243_v5 = vmul.f32 %v2239_v1, %v2239_v1  ;;  %v2245_v6 = vmul.f32 %v2241_v2, %v2241_v2 }
 0x307   :  { %v2244_v7 = vmul.f32 %v2240_v3, %v2240_v3  ;;  %v2246_v8 = vmul.f32 %v2242_v4, %v2242_v4 }
 0x308   :  { %v2247_v12 = vrot.slane %v2243_v5, 4  ;;  %v2259_v15 = vrot.slane %v2245_v6, 4 }
 0x309   :  { %v2253_v16 = vrot.slane %v2244_v7, 4  ;;  %v2265_v17 = vrot.slane %v2246_v8, 4 }
 0x30a   :  { %v2248_v18 = vadd.f32 %v2247_v12, %v2243_v5  ;;  %v2260_v56 = vadd.f32 %v2259_v15, %v2245_v6 }
 0x30b   :  { %v2254_v19 = vadd.f32 %v2253_v16, %v2244_v7  ;;  %v2266_v26 = vadd.f32 %v2265_v17, %v2246_v8 }
 0x30c   :  { %v2249_v55 = vrot.slane %v2248_v18, 2  ;;  %v2261_v57 = vrot.slane %v2260_v56, 2 }
 0x30d   :  { %v2255_v25 = vrot.slane %v2254_v19, 2  ;;  %v2267_v21 = vrot.slane %v2266_v26, 2 }
 0x30e   :  { %v2250_v22 = vadd.f32 %v2249_v55, %v2248_v18  ;;  %v2262_v23 = vadd.f32 %v2261_v57, %v2260_v56 }
 0x30f   :  { %v2256_v24 = vadd.f32 %v2255_v25, %v2254_v19  ;;  %v2268_v30 = vadd.f32 %v2267_v21, %v2266_v26 }
 0x310   :  { %v2251_v31 = vrot.slane %v2250_v22, 1  ;;  %v2263_v32 = vrot.slane %v2262_v23, 1 }
 0x311   :  { %v2257_v33 = vrot.slane %v2256_v24, 1  ;;  %v2269_v34 = vrot.slane %v2268_v30, 1 }
 0x312   :  { %v2252_v35 = vadd.f32 %v2251_v31, %v2250_v22  ;;  %v2264_v36 = vadd.f32 %v2263_v32, %v2262_v23 }
 0x313   :  { %v2258_v37 = vadd.f32 %v2257_v33, %v2256_v24  ;;  %v2270_v38 = vadd.f32 %v2269_v34, %v2268_v30 }
 0x314   :  { %v2271_v39 = vmul.f32 0.125, %v2252_v35  ;;  %v2273_v40 = vmul.f32 0.125, %v2264_v36 }
 0x315   :  { %v2272_v41 = vmul.f32 0.125, %v2258_v37  ;;  %v2274_v42 = vmul.f32 0.125, %v2270_v38  ;;  %v3023_v37 = vld [vmem:[%s3929_s10] ss:$0 sm:$0xff] }
 0x316   :  { %v2275_v43 = vadd.f32 1e-05, %v2271_v39  ;;  %v2277_v44 = vadd.f32 1e-05, %v2273_v40 }
 0x317   :  { %v2276_v45 = vadd.f32 1e-05, %v2272_v41  ;;  %v2278_v46 = vadd.f32 1e-05, %v2274_v42 }
 0x318   :  { %3560 = vrsqrt.f32 %v2275_v43 }
 0x319   :  { %3562 = vrsqrt.f32 %v2277_v44 }
 0x31a   :  { %3564 = vrsqrt.f32 %v2276_v45 }
 0x31b   :  { %3566 = vrsqrt.f32 %v2278_v46 }
 0x322   :  { %v3561_v47 = vpop.eup %3560 }
 0x323   :  { %v3563_v48 = vpop.eup %3562 }
 0x324   :  { %v3565_v50 = vpop.eup %3564 }
 0x325   :  { %v3567_v51 = vpop.eup %3566  ;;  %v2287_v52 = vcombine.low %v3561_v47, %v3565_v50 }
 0x326   :  { %v2288_v27 = vcombine.low %v3563_v48, %v3567_v51 }
 0x327   :  { %v2295_v53 = vrot.slane %v2287_v52, %v3815_v49 }
 0x328   :  { %v2302_v54 = vrot.slane %v2288_v27, %v3815_v49 }
 0x32a   :  { %v2303_v59 = vcombine.low %v2295_v53, %v2302_v54 }
 0x32c   :  { %v2310_v61 = vrot.slane %v2303_v59, %v3815_v49 }
 0x32e   :  { %v2312_v1 = vmul.f32 %v2310_v61, %v2209_v60 }
 0x330   :  { %v2325_v2 = vrot.slane %v2312_v1, %v3767_v11  ;;  %v2329_v3 = vrot.slane %v2312_v1, %v3776_v14  ;;  %v2317_v4 = vrot.slane %v2312_v1, %v3764_v10  ;;  %v2321_v5 = vrot.slane %v2312_v1, %v3773_v13 }
 0x332   :  { %v2336_v6 = vmul.f32 %v2325_v2, %v3875_v63  ;;  %v2337_v7 = vmul.f32 %v2329_v3, %v2238_v9  ;;  %v2371_v8 = vmul.f32 %v3863_v29, %v2329_v3  ;;  %v2334_v12 = vmul.f32 %v2317_v4, %v3873_v62  ;;  %v2210_v29 = vld [vmem:[%s3927_s8] sm:$0xf] }
 0x333   :  { %v2335_v15 = vmul.f32 %v2321_v5, %v3877_v0  ;;  %v2369_v16 = vmul.f32 %v3861_v28, %v2321_v5  ;;  %v2368_v17 = vmul.f32 %v3857_v58, %v2317_v4  ;;  %v2370_v18 = vmul.f32 %v3859_v20, %v2325_v2 }
 0x334   :  { %v2343_v56 = vcombine.low %v2336_v6, %v2337_v7 }
 0x335   :  { %v2342_v19 = vcombine.low %v2334_v12, %v2335_v15 }
 0x336   :  { %v2357_v26 = vrot.slane %v2343_v56, %v3815_v49 }
 0x337   :  { %v2350_v55 = vrot.slane %v2342_v19, %v3815_v49 }
 0x339   :  { %v2358_v63 = vcombine.low %v2350_v55, %v2357_v26 }
 0x33b   :  { %v2365_v62 = vrot.slane %v2358_v63, %v3815_v49 }
 0x33d   :  { %v2367_v0 = vsub.f32 %v2210_v29, %v2365_v62 }
 0x33f   :  { %v2380_v28 = vrot.slane %v2367_v0, %v3773_v13  ;;  %v2388_v58 = vrot.slane %v2367_v0, %v3776_v14  ;;  %v2376_v20 = vrot.slane %v2367_v0, %v3764_v10  ;;  %v2384_v9 = vrot.slane %v2367_v0, %v3767_v11 }
 0x341   :  { %v2394_v57 = vadd.f32 %v2380_v28, %v2369_v16  ;;  %v2396_v25 = vadd.f32 %v2388_v58, %v2371_v8  ;;  %v2393_v21 = vadd.f32 %v2376_v20, %v2368_v17  ;;  %v2395_v22 = vadd.f32 %v2384_v9, %v2370_v18 }
 0x343   :  { %vm2398_vm4 = vcmp.gt.f32.partialorder %v2394_v57, 0.0  ;;  %v2402_v23 = vmul.f32 0.01, %v2394_v57  ;;  %vm2400_vm5 = vcmp.gt.f32.partialorder %v2396_v25, 0.0  ;;  %v2404_v24 = vmul.f32 0.01, %v2396_v25 }
 0x344   :  { %vm2397_vm6 = vcmp.gt.f32.partialorder %v2393_v21, 0.0  ;;  %v2401_v30 = vmul.f32 0.01, %v2393_v21  ;;  %vm2399_vm7 = vcmp.gt.f32.partialorder %v2395_v22, 0.0  ;;  %v2403_v49 = vmul.f32 0.01, %v2395_v22 }
 0x345   :  { %v2406_v31 = vsel %vm2398_vm4, %v2394_v57, %v2402_v23  ;;  %v2408_v13 = vsel %vm2400_vm5, %v2396_v25, %v2404_v24 }
 0x346   :  { %v2410_v32 = vpack.c.bf16 %v2406_v31, %v2406_v31  ;;  %v2412_v14 = vpack.c.bf16 %v2408_v13, %v2408_v13  ;;  %v2405_v33 = vsel %vm2397_vm6, %v2393_v21, %v2401_v30  ;;  %v2407_v10 = vsel %vm2399_vm7, %v2395_v22, %v2403_v49 }
 0x347   :  { %v2409_v34 = vpack.c.bf16 %v2405_v33, %v2405_v33  ;;  %v2411_v11 = vpack.c.bf16 %v2407_v10, %v2407_v10 }
 0x348   :  { %2708 = vmatprep.mubr.bf16.mxu0 %v2410_v32  ;;  %2748 = vmatprep.mubr.bf16.mxu1 %v2412_v14 }
 0x349   :  { %2709 = vmatmul.mubr.bf16.vlgmr.msra.gmra.mrb[8].mxu0 %v2409_v34  ;;  %2749 = vmatmul.mubr.bf16.vlgmr.msra.gmra.mrb[8].mxu1 %v2411_v11 }
 0x41c   :  { %v3072_v35 = vpop.f32.mrb[8].mxu0  ;;  %v3094_v36 = vpop.f32.mrb[8].mxu1 }
 0x41d   :  { %v3073_v38 = vpop.f32.mrb[9].mxu0  ;;  %v3095_v39 = vpop.f32.mrb[9].mxu1 }
 0x41e   :  { %v3074_v40 = vadd.f32 %v3073_v38, %v3072_v35  ;;  %v3096_v41 = vadd.f32 %v3095_v39, %v3094_v36  ;;  %v3075_v42 = vpop.f32.mrb[10].mxu0  ;;  %v3097_v43 = vpop.f32.mrb[10].mxu1 }
 0x41f   :  { %v3076_v44 = vpop.f32.mrb[11].mxu0  ;;  %v3098_v45 = vpop.f32.mrb[11].mxu1 }
 0x420   :  { %v2711_v46 = vadd.f32 %v3074_v40, %v3023_v37 }
 0x422   :  { %v2751_v47 = vadd.f32 %v3096_v41, %v2711_v46 }
 0x424   :  { %2756 = vst [vmem:[%s3930_s11] sm:$0xff] %v2751_v47 }
 0x425   :  { %2761 = vsyncpa [#allocation3], 1 }
 0x426   :  { %2762 = vsyncpa [#allocation5], 1 }

</bundles_post_ra>
